<compile_context>
chip_gen: v5e
topology: v5e:2x2
jax: 0.10.0
libtpu: 0.0.40
codegen_flags: <defaults>
</compile_context>

<pallas_src>
import jax
import jax.numpy as jnp
from jax.experimental import pallas as pl
from jax.experimental.pallas import tpu as pltpu


def _fused_kernel(x_ref, w1_ref, b1_ref, w2_ref, b2_ref, o_ref):
    # x_ref : (C_in, tm)  f32 tile in VMEM (pixel axis on lanes)
    # w*_ref: (C_out, C_in) f32 scalars in SMEM
    # b*_ref: (C_out,)      f32 scalars in SMEM
    # o_ref : (C_out, tm)
    c_in = x_ref.shape[0]
    c_out = o_ref.shape[0]
    x = x_ref[...]
    for c in range(c_out):
        # 1x1 conv == K=3 channel contraction: do it as VPU broadcast-FMAs
        # (scalars come straight from SMEM/sreg; no MXU push/drain).
        t1 = x[0:1, :] * w1_ref[c, 0]
        v1 = x[0:1, :] * w2_ref[c, 0]
        for k in range(1, c_in):
            t1 = t1 + x[k:k + 1, :] * w1_ref[c, k]
            v1 = v1 + x[k:k + 1, :] * w2_ref[c, k]
        t1 = t1 + b1_ref[c]
        v1 = v1 + b2_ref[c]
        # t6 = t1*clamp(t1+3,0,6)/6 + v1*clamp(v1+3,0,6)/6  (hardswish-like)
        t5 = t1 * jnp.clip(t1 + 3.0, 0.0, 6.0) * (1.0 / 6.0)
        v5 = v1 * jnp.clip(v1 + 3.0, 0.0, 6.0) * (1.0 / 6.0)
        o_ref[c:c + 1, :] = (t5 + v5).astype(o_ref.dtype)


def _pick_tm(hw, n_batch, cap=65536):
    """Lane-dense tile along the pixel axis: multiple of 128, big enough to
    amortize per-step overhead, small enough for double-buffered VMEM, and
    leaving >= 2 total grid steps so both v7x TensorCores get work."""
    if hw % 128 != 0 or hw <= 128:
        return hw                      # full-extent block is always legal
    tm = min(cap, hw)
    tm -= tm % 128
    if n_batch * (-(-hw // tm)) < 2:   # only one grid step -> split for megacore
        half = (hw // 2) - ((hw // 2) % 128)
        if half >= 128:
            tm = half
    return tm


def fused_double_conv1x1_hswish(x_nchw, w1, b1, w2, b2, *, tm=None):
    """x_nchw: (N, C_in, H, W) f32.  w*: (C_out, C_in), b*: (C_out,)."""
    N, C_in, H, W = x_nchw.shape
    C_out = w1.shape[0]
    HW = H * W

    # NCHW is already channels-major: flatten spatial dims only (free reshape).
    x_cm = x_nchw.reshape(N, C_in, HW)

    if tm is None:
        tm = _pick_tm(HW, N)
    n_m = pl.cdiv(HW, tm)

    out_cm = pl.pallas_call(
        _fused_kernel,
        out_shape=jax.ShapeDtypeStruct((N, C_out, HW), x_nchw.dtype),
        grid=(N, n_m),
        in_specs=[
            pl.BlockSpec((None, C_in, tm), lambda n, i: (n, 0, i)),
            pl.BlockSpec(memory_space=pltpu.MemorySpace.SMEM),  # w1
            pl.BlockSpec(memory_space=pltpu.MemorySpace.SMEM),  # b1
            pl.BlockSpec(memory_space=pltpu.MemorySpace.SMEM),  # w2
            pl.BlockSpec(memory_space=pltpu.MemorySpace.SMEM),  # b2
        ],
        out_specs=pl.BlockSpec((None, C_out, tm), lambda n, i: (n, 0, i)),
        compiler_params=pltpu.CompilerParams(
            dimension_semantics=("parallel", "parallel")),
    )(x_cm, w1, b1, w2, b2)

    return out_cm.reshape(N, C_out, H, W)


def reference(x_nchw, w1, b1, w2, b2):
    # Pure-JAX reference of the PyTorch forward (1x1 conv == channel matmul).
    N, C, H, W = x_nchw.shape
    x = x_nchw.reshape(N, C, H * W)
    t1 = jnp.einsum("oc,ncm->nom", w1, x) + b1[None, :, None]
    v1 = jnp.einsum("oc,ncm->nom", w2, x) + b2[None, :, None]
    t5 = t1 * jnp.clip(t1 + 3.0, 0.0, 6.0) / 6.0
    v5 = v1 * jnp.clip(v1 + 3.0, 0.0, 6.0) / 6.0
    return (t5 + v5).reshape(N, w1.shape[0], H, W)


if __name__ == "__main__":
    key = jax.random.PRNGKey(0)
    k_x, k_w1, k_b1, k_w2, k_b2 = jax.random.split(key, 5)

    N, C, H, W = 1, 3, 64, 64
    x = jax.random.normal(k_x, (N, C, H, W), dtype=jnp.float32)

    # Deterministic Conv2d(3, 3, 1) parameters (fan_in = C*1*1 = 3)
    bound = 1.0 / (C ** 0.5)
    w1 = jax.random.uniform(k_w1, (3, C), jnp.float32, -bound, bound)
    b1 = jax.random.uniform(k_b1, (3,), jnp.float32, -bound, bound)
    w2 = jax.random.uniform(k_w2, (3, C), jnp.float32, -bound, bound)
    b2 = jax.random.uniform(k_b2, (3,), jnp.float32, -bound, bound)

    out = fused_double_conv1x1_hswish(x, w1, b1, w2, b2)
    out = jax.block_until_ready(out)

    ref = reference(x, w1, b1, w2, b2)
    assert out.shape == (N, 3, H, W)
    assert jnp.allclose(out, ref, atol=1e-5, rtol=1e-5)
    print("KERNEL_OK")
</pallas_src>

<mosaic_0001>
module attributes {stable_mosaic.version = 11 : i64} {
  func.func @_fused_kernel(%arg0: i32, %arg1: i32, %arg2: memref<1x3x2048xf32, #tpu.memory_space<vmem>>, %arg3: memref<3x3xf32, #tpu.memory_space<smem>>, %arg4: memref<3xf32, #tpu.memory_space<smem>>, %arg5: memref<3x3xf32, #tpu.memory_space<smem>>, %arg6: memref<3xf32, #tpu.memory_space<smem>>, %arg7: memref<1x3x2048xf32, #tpu.memory_space<vmem>>) attributes {dimension_semantics = [#tpu.dimension_semantics<parallel>, #tpu.dimension_semantics<parallel>], iteration_bounds = array<i64: 1, 2>, scalar_prefetch = 0 : i64, scratch_operands = 0 : i64, tpu.core_type = #tpu.core_type<tc>, window_params = [{transform_indices = @transform_0, window_bounds = array<i64: 1, 3, 2048>}, {transform_indices = @transform_1, window_bounds = array<i64: 3, 3>}, {transform_indices = @transform_2, window_bounds = array<i64: 3>}, {transform_indices = @transform_3, window_bounds = array<i64: 3, 3>}, {transform_indices = @transform_4, window_bounds = array<i64: 3>}, {transform_indices = @transform_5, window_bounds = array<i64: 1, 3, 2048>}]} {
    %c0 = arith.constant 0 : index
    %c0_0 = arith.constant 0 : index
    %c0_1 = arith.constant 0 : index
    %0 = vector.load %arg2[%c0, %c0_0, %c0_1] : memref<1x3x2048xf32, #tpu.memory_space<vmem>>, vector<1x3x2048xf32>
    %1 = vector.shape_cast %0 : vector<1x3x2048xf32> to vector<3x2048xf32>
    %2 = vector.extract_strided_slice %1 {offsets = [0, 0], sizes = [1, 2048], strides = [1, 1]} : vector<3x2048xf32> to vector<1x2048xf32>
    %c0_2 = arith.constant 0 : index
    %c0_3 = arith.constant 0 : index
    %3 = memref.load %arg3[%c0_2, %c0_3] : memref<3x3xf32, #tpu.memory_space<smem>>
    %4 = vector.broadcast %3 : f32 to vector<1x2048xf32>
    %5 = arith.mulf %2, %4 : vector<1x2048xf32>
    %6 = vector.extract_strided_slice %1 {offsets = [0, 0], sizes = [1, 2048], strides = [1, 1]} : vector<3x2048xf32> to vector<1x2048xf32>
    %c0_4 = arith.constant 0 : index
    %c0_5 = arith.constant 0 : index
    %7 = memref.load %arg5[%c0_4, %c0_5] : memref<3x3xf32, #tpu.memory_space<smem>>
    %8 = vector.broadcast %7 : f32 to vector<1x2048xf32>
    %9 = arith.mulf %6, %8 : vector<1x2048xf32>
    %10 = vector.extract_strided_slice %1 {offsets = [1, 0], sizes = [1, 2048], strides = [1, 1]} : vector<3x2048xf32> to vector<1x2048xf32>
    %c0_6 = arith.constant 0 : index
    %c1 = arith.constant 1 : index
    %11 = memref.load %arg3[%c0_6, %c1] : memref<3x3xf32, #tpu.memory_space<smem>>
    %12 = vector.broadcast %11 : f32 to vector<1x2048xf32>
    %13 = arith.mulf %10, %12 : vector<1x2048xf32>
    %14 = arith.addf %5, %13 : vector<1x2048xf32>
    %15 = vector.extract_strided_slice %1 {offsets = [1, 0], sizes = [1, 2048], strides = [1, 1]} : vector<3x2048xf32> to vector<1x2048xf32>
    %c0_7 = arith.constant 0 : index
    %c1_8 = arith.constant 1 : index
    %16 = memref.load %arg5[%c0_7, %c1_8] : memref<3x3xf32, #tpu.memory_space<smem>>
    %17 = vector.broadcast %16 : f32 to vector<1x2048xf32>
    %18 = arith.mulf %15, %17 : vector<1x2048xf32>
    %19 = arith.addf %9, %18 : vector<1x2048xf32>
    %20 = vector.extract_strided_slice %1 {offsets = [2, 0], sizes = [1, 2048], strides = [1, 1]} : vector<3x2048xf32> to vector<1x2048xf32>
    %c0_9 = arith.constant 0 : index
    %c2 = arith.constant 2 : index
    %21 = memref.load %arg3[%c0_9, %c2] : memref<3x3xf32, #tpu.memory_space<smem>>
    %22 = vector.broadcast %21 : f32 to vector<1x2048xf32>
    %23 = arith.mulf %20, %22 : vector<1x2048xf32>
    %24 = arith.addf %14, %23 : vector<1x2048xf32>
    %25 = vector.extract_strided_slice %1 {offsets = [2, 0], sizes = [1, 2048], strides = [1, 1]} : vector<3x2048xf32> to vector<1x2048xf32>
    %c0_10 = arith.constant 0 : index
    %c2_11 = arith.constant 2 : index
    %26 = memref.load %arg5[%c0_10, %c2_11] : memref<3x3xf32, #tpu.memory_space<smem>>
    %27 = vector.broadcast %26 : f32 to vector<1x2048xf32>
    %28 = arith.mulf %25, %27 : vector<1x2048xf32>
    %29 = arith.addf %19, %28 : vector<1x2048xf32>
    %c0_12 = arith.constant 0 : index
    %30 = memref.load %arg4[%c0_12] : memref<3xf32, #tpu.memory_space<smem>>
    %31 = vector.broadcast %30 : f32 to vector<1x2048xf32>
    %32 = arith.addf %24, %31 : vector<1x2048xf32>
    %c0_13 = arith.constant 0 : index
    %33 = memref.load %arg6[%c0_13] : memref<3xf32, #tpu.memory_space<smem>>
    %34 = vector.broadcast %33 : f32 to vector<1x2048xf32>
    %35 = arith.addf %29, %34 : vector<1x2048xf32>
    %cst = arith.constant 3.000000e+00 : f32
    %36 = vector.broadcast %cst : f32 to vector<1x2048xf32>
    %37 = arith.addf %32, %36 : vector<1x2048xf32>
    %cst_14 = arith.constant 0.000000e+00 : f32
    %cst_15 = arith.constant 6.000000e+00 : f32
    %38 = vector.broadcast %cst_14 : f32 to vector<1x2048xf32>
    %39 = arith.maximumf %38, %37 : vector<1x2048xf32>
    %40 = vector.broadcast %cst_15 : f32 to vector<1x2048xf32>
    %41 = arith.minimumf %40, %39 : vector<1x2048xf32>
    %42 = arith.mulf %32, %41 : vector<1x2048xf32>
    %cst_16 = arith.constant 0.166666672 : f32
    %43 = vector.broadcast %cst_16 : f32 to vector<1x2048xf32>
    %44 = arith.mulf %42, %43 : vector<1x2048xf32>
    %cst_17 = arith.constant 3.000000e+00 : f32
    %45 = vector.broadcast %cst_17 : f32 to vector<1x2048xf32>
    %46 = arith.addf %35, %45 : vector<1x2048xf32>
    %cst_18 = arith.constant 0.000000e+00 : f32
    %cst_19 = arith.constant 6.000000e+00 : f32
    %47 = vector.broadcast %cst_18 : f32 to vector<1x2048xf32>
    %48 = arith.maximumf %47, %46 : vector<1x2048xf32>
    %49 = vector.broadcast %cst_19 : f32 to vector<1x2048xf32>
    %50 = arith.minimumf %49, %48 : vector<1x2048xf32>
    %51 = arith.mulf %35, %50 : vector<1x2048xf32>
    %cst_20 = arith.constant 0.166666672 : f32
    %52 = vector.broadcast %cst_20 : f32 to vector<1x2048xf32>
    %53 = arith.mulf %51, %52 : vector<1x2048xf32>
    %54 = arith.addf %44, %53 : vector<1x2048xf32>
    %c0_21 = arith.constant 0 : index
    %c0_22 = arith.constant 0 : index
    %c0_23 = arith.constant 0 : index
    %55 = vector.load %arg7[%c0_21, %c0_22, %c0_23] : memref<1x3x2048xf32, #tpu.memory_space<vmem>>, vector<1x1x2048xf32>
    %56 = vector.shape_cast %55 : vector<1x1x2048xf32> to vector<1x2048xf32>
    %57 = vector.shape_cast %54 : vector<1x2048xf32> to vector<1x1x2048xf32>
    tpu.vector_store %arg7[%c0_21, %c0_22, %c0_23], %57 {strides = array<i32>} : memref<1x3x2048xf32, #tpu.memory_space<vmem>>, vector<1x1x2048xf32>,
    %58 = vector.extract_strided_slice %1 {offsets = [0, 0], sizes = [1, 2048], strides = [1, 1]} : vector<3x2048xf32> to vector<1x2048xf32>
    %c1_24 = arith.constant 1 : index
    %c0_25 = arith.constant 0 : index
    %59 = memref.load %arg3[%c1_24, %c0_25] : memref<3x3xf32, #tpu.memory_space<smem>>
    %60 = vector.broadcast %59 : f32 to vector<1x2048xf32>
    %61 = arith.mulf %58, %60 : vector<1x2048xf32>
    %62 = vector.extract_strided_slice %1 {offsets = [0, 0], sizes = [1, 2048], strides = [1, 1]} : vector<3x2048xf32> to vector<1x2048xf32>
    %c1_26 = arith.constant 1 : index
    %c0_27 = arith.constant 0 : index
    %63 = memref.load %arg5[%c1_26, %c0_27] : memref<3x3xf32, #tpu.memory_space<smem>>
    %64 = vector.broadcast %63 : f32 to vector<1x2048xf32>
    %65 = arith.mulf %62, %64 : vector<1x2048xf32>
    %66 = vector.extract_strided_slice %1 {offsets = [1, 0], sizes = [1, 2048], strides = [1, 1]} : vector<3x2048xf32> to vector<1x2048xf32>
    %c1_28 = arith.constant 1 : index
    %c1_29 = arith.constant 1 : index
    %67 = memref.load %arg3[%c1_28, %c1_29] : memref<3x3xf32, #tpu.memory_space<smem>>
    %68 = vector.broadcast %67 : f32 to vector<1x2048xf32>
    %69 = arith.mulf %66, %68 : vector<1x2048xf32>
    %70 = arith.addf %61, %69 : vector<1x2048xf32>
    %71 = vector.extract_strided_slice %1 {offsets = [1, 0], sizes = [1, 2048], strides = [1, 1]} : vector<3x2048xf32> to vector<1x2048xf32>
    %c1_30 = arith.constant 1 : index
    %c1_31 = arith.constant 1 : index
    %72 = memref.load %arg5[%c1_30, %c1_31] : memref<3x3xf32, #tpu.memory_space<smem>>
    %73 = vector.broadcast %72 : f32 to vector<1x2048xf32>
    %74 = arith.mulf %71, %73 : vector<1x2048xf32>
    %75 = arith.addf %65, %74 : vector<1x2048xf32>
    %76 = vector.extract_strided_slice %1 {offsets = [2, 0], sizes = [1, 2048], strides = [1, 1]} : vector<3x2048xf32> to vector<1x2048xf32>
    %c1_32 = arith.constant 1 : index
    %c2_33 = arith.constant 2 : index
    %77 = memref.load %arg3[%c1_32, %c2_33] : memref<3x3xf32, #tpu.memory_space<smem>>
    %78 = vector.broadcast %77 : f32 to vector<1x2048xf32>
    %79 = arith.mulf %76, %78 : vector<1x2048xf32>
    %80 = arith.addf %70, %79 : vector<1x2048xf32>
    %81 = vector.extract_strided_slice %1 {offsets = [2, 0], sizes = [1, 2048], strides = [1, 1]} : vector<3x2048xf32> to vector<1x2048xf32>
    %c1_34 = arith.constant 1 : index
    %c2_35 = arith.constant 2 : index
    %82 = memref.load %arg5[%c1_34, %c2_35] : memref<3x3xf32, #tpu.memory_space<smem>>
    %83 = vector.broadcast %82 : f32 to vector<1x2048xf32>
    %84 = arith.mulf %81, %83 : vector<1x2048xf32>
    %85 = arith.addf %75, %84 : vector<1x2048xf32>
    %c1_36 = arith.constant 1 : index
    %86 = memref.load %arg4[%c1_36] : memref<3xf32, #tpu.memory_space<smem>>
    %87 = vector.broadcast %86 : f32 to vector<1x2048xf32>
    %88 = arith.addf %80, %87 : vector<1x2048xf32>
    %c1_37 = arith.constant 1 : index
    %89 = memref.load %arg6[%c1_37] : memref<3xf32, #tpu.memory_space<smem>>
    %90 = vector.broadcast %89 : f32 to vector<1x2048xf32>
    %91 = arith.addf %85, %90 : vector<1x2048xf32>
    %cst_38 = arith.constant 3.000000e+00 : f32
    %92 = vector.broadcast %cst_38 : f32 to vector<1x2048xf32>
    %93 = arith.addf %88, %92 : vector<1x2048xf32>
    %cst_39 = arith.constant 0.000000e+00 : f32
    %cst_40 = arith.constant 6.000000e+00 : f32
    %94 = vector.broadcast %cst_39 : f32 to vector<1x2048xf32>
    %95 = arith.maximumf %94, %93 : vector<1x2048xf32>
    %96 = vector.broadcast %cst_40 : f32 to vector<1x2048xf32>
    %97 = arith.minimumf %96, %95 : vector<1x2048xf32>
    %98 = arith.mulf %88, %97 : vector<1x2048xf32>
    %cst_41 = arith.constant 0.166666672 : f32
    %99 = vector.broadcast %cst_41 : f32 to vector<1x2048xf32>
    %100 = arith.mulf %98, %99 : vector<1x2048xf32>
    %cst_42 = arith.constant 3.000000e+00 : f32
    %101 = vector.broadcast %cst_42 : f32 to vector<1x2048xf32>
    %102 = arith.addf %91, %101 : vector<1x2048xf32>
    %cst_43 = arith.constant 0.000000e+00 : f32
    %cst_44 = arith.constant 6.000000e+00 : f32
    %103 = vector.broadcast %cst_43 : f32 to vector<1x2048xf32>
    %104 = arith.maximumf %103, %102 : vector<1x2048xf32>
    %105 = vector.broadcast %cst_44 : f32 to vector<1x2048xf32>
    %106 = arith.minimumf %105, %104 : vector<1x2048xf32>
    %107 = arith.mulf %91, %106 : vector<1x2048xf32>
    %cst_45 = arith.constant 0.166666672 : f32
    %108 = vector.broadcast %cst_45 : f32 to vector<1x2048xf32>
    %109 = arith.mulf %107, %108 : vector<1x2048xf32>
    %110 = arith.addf %100, %109 : vector<1x2048xf32>
    %c0_46 = arith.constant 0 : index
    %c1_47 = arith.constant 1 : index
    %c0_48 = arith.constant 0 : index
    %111 = vector.load %arg7[%c0_46, %c1_47, %c0_48] : memref<1x3x2048xf32, #tpu.memory_space<vmem>>, vector<1x1x2048xf32>
    %112 = vector.shape_cast %111 : vector<1x1x2048xf32> to vector<1x2048xf32>
    %113 = vector.shape_cast %110 : vector<1x2048xf32> to vector<1x1x2048xf32>
    tpu.vector_store %arg7[%c0_46, %c1_47, %c0_48], %113 {strides = array<i32>} : memref<1x3x2048xf32, #tpu.memory_space<vmem>>, vector<1x1x2048xf32>,
    %114 = vector.extract_strided_slice %1 {offsets = [0, 0], sizes = [1, 2048], strides = [1, 1]} : vector<3x2048xf32> to vector<1x2048xf32>
    %c2_49 = arith.constant 2 : index
    %c0_50 = arith.constant 0 : index
    %115 = memref.load %arg3[%c2_49, %c0_50] : memref<3x3xf32, #tpu.memory_space<smem>>
    %116 = vector.broadcast %115 : f32 to vector<1x2048xf32>
    %117 = arith.mulf %114, %116 : vector<1x2048xf32>
    %118 = vector.extract_strided_slice %1 {offsets = [0, 0], sizes = [1, 2048], strides = [1, 1]} : vector<3x2048xf32> to vector<1x2048xf32>
    %c2_51 = arith.constant 2 : index
    %c0_52 = arith.constant 0 : index
    %119 = memref.load %arg5[%c2_51, %c0_52] : memref<3x3xf32, #tpu.memory_space<smem>>
    %120 = vector.broadcast %119 : f32 to vector<1x2048xf32>
    %121 = arith.mulf %118, %120 : vector<1x2048xf32>
    %122 = vector.extract_strided_slice %1 {offsets = [1, 0], sizes = [1, 2048], strides = [1, 1]} : vector<3x2048xf32> to vector<1x2048xf32>
    %c2_53 = arith.constant 2 : index
    %c1_54 = arith.constant 1 : index
    %123 = memref.load %arg3[%c2_53, %c1_54] : memref<3x3xf32, #tpu.memory_space<smem>>
    %124 = vector.broadcast %123 : f32 to vector<1x2048xf32>
    %125 = arith.mulf %122, %124 : vector<1x2048xf32>
    %126 = arith.addf %117, %125 : vector<1x2048xf32>
    %127 = vector.extract_strided_slice %1 {offsets = [1, 0], sizes = [1, 2048], strides = [1, 1]} : vector<3x2048xf32> to vector<1x2048xf32>
    %c2_55 = arith.constant 2 : index
    %c1_56 = arith.constant 1 : index
    %128 = memref.load %arg5[%c2_55, %c1_56] : memref<3x3xf32, #tpu.memory_space<smem>>
    %129 = vector.broadcast %128 : f32 to vector<1x2048xf32>
    %130 = arith.mulf %127, %129 : vector<1x2048xf32>
    %131 = arith.addf %121, %130 : vector<1x2048xf32>
    %132 = vector.extract_strided_slice %1 {offsets = [2, 0], sizes = [1, 2048], strides = [1, 1]} : vector<3x2048xf32> to vector<1x2048xf32>
    %c2_57 = arith.constant 2 : index
    %c2_58 = arith.constant 2 : index
    %133 = memref.load %arg3[%c2_57, %c2_58] : memref<3x3xf32, #tpu.memory_space<smem>>
    %134 = vector.broadcast %133 : f32 to vector<1x2048xf32>
    %135 = arith.mulf %132, %134 : vector<1x2048xf32>
    %136 = arith.addf %126, %135 : vector<1x2048xf32>
    %137 = vector.extract_strided_slice %1 {offsets = [2, 0], sizes = [1, 2048], strides = [1, 1]} : vector<3x2048xf32> to vector<1x2048xf32>
    %c2_59 = arith.constant 2 : index
    %c2_60 = arith.constant 2 : index
    %138 = memref.load %arg5[%c2_59, %c2_60] : memref<3x3xf32, #tpu.memory_space<smem>>
    %139 = vector.broadcast %138 : f32 to vector<1x2048xf32>
    %140 = arith.mulf %137, %139 : vector<1x2048xf32>
    %141 = arith.addf %131, %140 : vector<1x2048xf32>
    %c2_61 = arith.constant 2 : index
    %142 = memref.load %arg4[%c2_61] : memref<3xf32, #tpu.memory_space<smem>>
    %143 = vector.broadcast %142 : f32 to vector<1x2048xf32>
    %144 = arith.addf %136, %143 : vector<1x2048xf32>
    %c2_62 = arith.constant 2 : index
    %145 = memref.load %arg6[%c2_62] : memref<3xf32, #tpu.memory_space<smem>>
    %146 = vector.broadcast %145 : f32 to vector<1x2048xf32>
    %147 = arith.addf %141, %146 : vector<1x2048xf32>
    %cst_63 = arith.constant 3.000000e+00 : f32
    %148 = vector.broadcast %cst_63 : f32 to vector<1x2048xf32>
    %149 = arith.addf %144, %148 : vector<1x2048xf32>
    %cst_64 = arith.constant 0.000000e+00 : f32
    %cst_65 = arith.constant 6.000000e+00 : f32
    %150 = vector.broadcast %cst_64 : f32 to vector<1x2048xf32>
    %151 = arith.maximumf %150, %149 : vector<1x2048xf32>
    %152 = vector.broadcast %cst_65 : f32 to vector<1x2048xf32>
    %153 = arith.minimumf %152, %151 : vector<1x2048xf32>
    %154 = arith.mulf %144, %153 : vector<1x2048xf32>
    %cst_66 = arith.constant 0.166666672 : f32
    %155 = vector.broadcast %cst_66 : f32 to vector<1x2048xf32>
    %156 = arith.mulf %154, %155 : vector<1x2048xf32>
    %cst_67 = arith.constant 3.000000e+00 : f32
    %157 = vector.broadcast %cst_67 : f32 to vector<1x2048xf32>
    %158 = arith.addf %147, %157 : vector<1x2048xf32>
    %cst_68 = arith.constant 0.000000e+00 : f32
    %cst_69 = arith.constant 6.000000e+00 : f32
    %159 = vector.broadcast %cst_68 : f32 to vector<1x2048xf32>
    %160 = arith.maximumf %159, %158 : vector<1x2048xf32>
    %161 = vector.broadcast %cst_69 : f32 to vector<1x2048xf32>
    %162 = arith.minimumf %161, %160 : vector<1x2048xf32>
    %163 = arith.mulf %147, %162 : vector<1x2048xf32>
    %cst_70 = arith.constant 0.166666672 : f32
    %164 = vector.broadcast %cst_70 : f32 to vector<1x2048xf32>
    %165 = arith.mulf %163, %164 : vector<1x2048xf32>
    %166 = arith.addf %156, %165 : vector<1x2048xf32>
    %c0_71 = arith.constant 0 : index
    %c2_72 = arith.constant 2 : index
    %c0_73 = arith.constant 0 : index
    %167 = vector.load %arg7[%c0_71, %c2_72, %c0_73] : memref<1x3x2048xf32, #tpu.memory_space<vmem>>, vector<1x1x2048xf32>
    %168 = vector.shape_cast %167 : vector<1x1x2048xf32> to vector<1x2048xf32>
    %169 = vector.shape_cast %166 : vector<1x2048xf32> to vector<1x1x2048xf32>
    tpu.vector_store %arg7[%c0_71, %c2_72, %c0_73], %169 {strides = array<i32>} : memref<1x3x2048xf32, #tpu.memory_space<vmem>>, vector<1x1x2048xf32>,
    return
  }
  func.func @transform_0(%arg0: i32, %arg1: i32) -> (i32, i32, i32) {
    %c0_i32 = arith.constant 0 : i32
    %c0_i32_0 = arith.constant 0 : i32
    return %arg0, %c0_i32, %arg1 : i32, i32, i32
  }
  func.func @transform_1(%arg0: i32, %arg1: i32) -> (i32, i32) {
    %c0_i32 = arith.constant 0 : i32
    %c0_i32_0 = arith.constant 0 : i32
    %c0_i32_1 = arith.constant 0 : i32
    return %c0_i32, %c0_i32_0 : i32, i32
  }
  func.func @transform_2(%arg0: i32, %arg1: i32) -> i32 {
    %c0_i32 = arith.constant 0 : i32
    %c0_i32_0 = arith.constant 0 : i32
    return %c0_i32 : i32
  }
  func.func @transform_3(%arg0: i32, %arg1: i32) -> (i32, i32) {
    %c0_i32 = arith.constant 0 : i32
    %c0_i32_0 = arith.constant 0 : i32
    %c0_i32_1 = arith.constant 0 : i32
    return %c0_i32, %c0_i32_0 : i32, i32
  }
  func.func @transform_4(%arg0: i32, %arg1: i32) -> i32 {
    %c0_i32 = arith.constant 0 : i32
    %c0_i32_0 = arith.constant 0 : i32
    return %c0_i32 : i32
  }
  func.func @transform_5(%arg0: i32, %arg1: i32) -> (i32, i32, i32) {
    %c0_i32 = arith.constant 0 : i32
    %c0_i32_0 = arith.constant 0 : i32
    return %arg0, %c0_i32, %arg1 : i32, i32, i32
  }
}

</mosaic_0001>

<bundles_post_ra>
// kernel: tpu_custom_call.1
= control target key start
LH: loop header
LB: loop body
LE: loop exit
PB: predicated region body
PF: predicated region fallthrough
CT: control target
= control target key end

     0   :  { %10 = vsyncpa [#allocation3], 0  ;;  %s2457_s0 = inlined_call_operand.vmem [shape: f32[1,3,4096], index: 0, kind: input, shape index: {}]   ;;  %s2458_s1 = inlined_call_operand.vmem [shape: f32[3,3], index: 1, kind: input, shape index: {}]   ;;  %s2459_s2 = inlined_call_operand.vmem [shape: f32[3], index: 2, kind: input, shape index: {}]   ;;  %s2460_s3 = inlined_call_operand.vmem [shape: f32[3,3], index: 3, kind: input, shape index: {}]   ;;  %s2461_s4 = inlined_call_operand.vmem [shape: f32[3], index: 4, kind: input, shape index: {}]   ;;  %s2462_s5 = inlined_call_operand.vmem [shape: f32[1,3,4096], index: 5, kind: output, shape index: {}]  }
   0x1   :  { %11 = vsyncpa [#allocation5], 0 }
   0x2   :  { %12 = vsyncpa [#allocation8], 0  ;;  %s1911_s18 = smov 0   ;;  %s1913_s19 = smov 0  }
   0x3   :  { %s1915_s20 = smov 0  }
   0x4 LB: > { %s197_s23 = sshll.u32 %s2459_s2, 4  ;;  %s1568_s24 = sadd.s32 4294967295, %s1875_s20   ;;  %s1875_s20 = sphi %s1915_s20, %s18_s20   ;;  %s1871_s19 = sphi %s1913_s19, %s2467_s19   ;;  %s1867_s18 = sphi %s1911_s18, %s2466_s18   ;;  %s198_s23 = int_to_ptr.vmem [resolvable:$true] %s197_s23 }
   0x5   : > { %p1570_p0 = scmp.ge.s32.totalorder %s1875_s20, 1  ;;  %p175_p1 = scmp.lt.s32.totalorder %s1875_s20, 3 }
   0x6   : > { %p1932_p2 = scmp.eq.s32.totalorder %s1568_s24, 0  ;;  %s27_s27 = sadd.s32 1, %s1871_s19 }
   0x7   : > { %p1936_p3 = pnand %p1570_p0, %p175_p1  ;;  %s187_s30 = sshll.u32 %s2458_s1, 4  ;;  %s188_s30 = int_to_ptr.vmem [resolvable:$true] %s187_s30 }
   0x8   : > { %p28_p6 = scmp.ge.s32.totalorder %s27_s27, 2  ;;  %s207_s9 = sshll.u32 %s2460_s3, 4  ;;  %s208_s9 = int_to_ptr.vmem [resolvable:$true] %s207_s9 }
   0x9   : > { %p1724_p4 = pneg %p1936_p3  ;;  %s1877_s10 = smov [#allocation4]  }
   0xa   : > { %s2469_s27 = smov (%p28_p6, %s27_s27), 0  ;;  %s1878_s11 = smov [#allocation2]  }
   0xb   : > { %p1948_p5 = pnand %p1932_p2, %p1724_p4  ;;  %s1879_s12 = smov [#allocation6]  }
   0xc   : > { %s217_s15 = sshll.u32 %s2461_s4, 4  ;;  %s1880_s16 = smov [#allocation7]   ;;  %s218_s15 = int_to_ptr.vmem [resolvable:$true] %s217_s15 }
   0xd   : > { %1730 = dma.vmem_to_smem (!%p1948_p5), %s198_s23, 16, %s1877_s10, [#allocation5]  }
   0xe   : > { %1727 = dma.vmem_to_smem (!%p1948_p5), %s188_s30, 64, %s1878_s11, [#allocation3]  }
   0xf   : > { %1733 = dma.vmem_to_smem (!%p1948_p5), %s208_s9, 64, %s1879_s12, [#allocation5]  }
  0x10   : > { %1736 = dma.vmem_to_smem (!%p1948_p5), %s218_s15, 16, %s1880_s16, [#allocation8]  }
  0x11   : > { %243 = sbr.rel (%p1936_p3) target bundleno = 228 (0xe4), region = 40 }
  0x16   : > { %1854 = dma.done.wait (%p1932_p2), [#allocation3], 64  }
  0x17   : > { %1856 = vsyncadd (%p1932_p2), [#allocation3], 4294967232 }
  0x18   : > { %1858 = dma.done.wait (%p1932_p2), [#allocation5], 80  }
  0x19   : > { %1860 = vsyncadd (%p1932_p2), [#allocation5], 4294967216 }
  0x1a   : > { %1862 = dma.done.wait (%p1932_p2), [#allocation8], 16  }
  0x1b   : > { %1864 = vsyncadd (%p1932_p2), [#allocation8], 4294967280 }
  0x1c   : > { %265 = sfence }
  0x1d   : > { %s1581_s17 = sshll.u32 %s1867_s18, 4  ;;  %s324_s21 = sld [smem:[#allocation2]]  ;;  %vm674_vm0 = vcmask 1040384   ;;  %vm676_vm1 = vcmask 1042434   ;;  %vm678_vm2 = vcmask 1041408   ;;  %vm680_vm3 = vcmask 1044484  }
  0x1e   : > { %p299_p7 = scmp.lt.s32.totalorder %s1581_s17, 31  ;;  %s334_s22 = sld [smem:[#allocation6]]  ;;  %vm682_vm4 = vcmask 1046534   ;;  %vm684_vm5 = vcmask 1045508   ;;  %vm686_vm6 = vcmask 1043456  }
  0x1f   : > { %s1985_s23 = sld [smem:[#allocation2 + $0x1]] }
  0x20   : > { %s2471_s17 = smov (!%p299_p7, %s1581_s17), 31  ;;  %s1995_s18 = sld [smem:[#allocation6 + $0x1]] }
  0x21   : > { %s1582_s24 = sshll.u32 %s2471_s17, 2  ;;  %s2000_s25 = sld [smem:[#allocation2 + $0x2]] }
  0x22   : > { %s1993_s29 = scalar_lea.vmem %s2457_s0, %s1582_s24  ;;  %s2062_s30 = sld [smem:[#allocation6 + $0x2]] }
  0x23   : > { %v325_v0 = vstv %s324_s21  ;;  %v1998_v1 = vld [vmem:[%s1993_s29] sm:$0x77]  ;;  %v2003_v3 = vld [vmem:[%s1993_s29 + $0x8] sm:$0x77]  ;;  %v2006_v4 = vld [vmem:[%s1993_s29 + $0x10] sm:$0x77]  ;;  %s2133_s13 = scalar_lea.vmem %s2462_s5, %s1582_s24 }
  0x24   : > { %v335_v2 = vstv %s334_s22  ;;  %v2009_v5 = vld [vmem:[%s1993_s29 + $0x18] sm:$0x77]  ;;  %v326_v6 = vmul.f32 %v325_v0, %v1998_v1  ;;  %v2013_v7 = vld [vmem:[%s1993_s29 + $0x20] sm:$0x77]  ;;  %v2016_v8 = vld [vmem:[%s1993_s29 + $0x28] sm:$0x77]  ;;  %v327_v10 = vmul.f32 %v325_v0, %v2003_v3  ;;  %v328_v11 = vmul.f32 %v325_v0, %v2006_v4 }
  0x25   : > { %v2019_v9 = vld [vmem:[%s1993_s29 + $0x30] sm:$0x77]  ;;  %v329_v12 = vmul.f32 %v325_v0, %v2009_v5  ;;  %v336_v13 = vmul.f32 %v335_v2, %v1998_v1  ;;  %v2026_v14 = vld [vmem:[%s1993_s29 + $0x38] sm:$0x77]  ;;  %v330_v15 = vmul.f32 %v325_v0, %v2013_v7  ;;  %v331_v16 = vmul.f32 %v325_v0, %v2016_v8  ;;  %s2064_s6 = sld [smem:[#allocation4]] }
  0x26   : > { %v332_v17 = vmul.f32 %v325_v0, %v2019_v9  ;;  %v337_v18 = vmul.f32 %v335_v2, %v2003_v3  ;;  %v333_v19 = vmul.f32 %v325_v0, %v2026_v14  ;;  %v338_v20 = vmul.f32 %v335_v2, %v2006_v4  ;;  %s2074_s7 = sld [smem:[#allocation7]] }
  0x27   : > { %v339_v21 = vmul.f32 %v335_v2, %v2009_v5  ;;  %v340_v22 = vmul.f32 %v335_v2, %v2013_v7  ;;  %v341_v23 = vmul.f32 %v335_v2, %v2016_v8  ;;  %v2038_v24 = vmul.f32 %v335_v2, %v2019_v9  ;;  %s2109_s8 = sld [smem:[#allocation2 + $0x80]] }
  0x28   : > { %v2041_v25 = vmul.f32 %v335_v2, %v2026_v14  ;;  %v345_v26 = vstv %s1985_s23  ;;  %v395_v41 = vstv %s1995_s18  ;;  %v445_v42 = vstv %s2000_s25  ;;  %s2122_s9 = sld [smem:[#allocation6 + $0x80]] }
  0x29   : > { %v346_v27 = vmul.f32 %v345_v26, %v1998_v1  ;;  %v347_v28 = vmul.f32 %v345_v26, %v2003_v3  ;;  %v348_v29 = vmul.f32 %v345_v26, %v2006_v4  ;;  %v349_v30 = vmul.f32 %v345_v26, %v2009_v5  ;;  %s2126_s10 = sld [smem:[#allocation2 + $0x81]] }
  0x2a   : > { %v350_v31 = vmul.f32 %v345_v26, %v2013_v7  ;;  %v351_v32 = vmul.f32 %v345_v26, %v2016_v8  ;;  %v352_v33 = vmul.f32 %v345_v26, %v2019_v9  ;;  %v353_v34 = vmul.f32 %v345_v26, %v2026_v14  ;;  %s2141_s14 = sld [smem:[#allocation6 + $0x81]] }
  0x2b   : > { %v1586_v35 = vrot.slane %v346_v27, 9  ;;  %v1587_v36 = vrot.slane %v347_v28, 9  ;;  %v1588_v37 = vrot.slane %v348_v29, 9  ;;  %v1589_v38 = vrot.slane %v349_v30, 9  ;;  %s2147_s15 = sld [smem:[#allocation2 + $0x82]] }
  0x2c   : > { %v1590_v39 = vrot.slane %v350_v31, 9  ;;  %v1591_v40 = vrot.slane %v351_v32, 9  ;;  %v1592_v43 = vrot.slane %v352_v33, 9  ;;  %v1593_v44 = vrot.slane %v353_v34, 9  ;;  %s2157_s16 = sld [smem:[#allocation6 + $0x82]] }
  0x2d   : > { %v386_v45 = vadd.f32 %v1586_v35, %v326_v6  ;;  %v387_v46 = vadd.f32 %v1587_v36, %v327_v10  ;;  %v388_v47 = vadd.f32 %v1588_v37, %v328_v11  ;;  %v389_v48 = vadd.f32 %v1589_v38, %v329_v12  ;;  %s2219_s17 = sld [smem:[#allocation4 + $0x1]] }
  0x2e   : > { %v390_v49 = vadd.f32 %v1590_v39, %v330_v15  ;;  %v391_v50 = vadd.f32 %v1591_v40, %v331_v16  ;;  %v396_v51 = vmul.f32 %v395_v41, %v1998_v1  ;;  %v397_v52 = vmul.f32 %v395_v41, %v2003_v3  ;;  %s2221_s21 = sld [smem:[#allocation7 + $0x1]] }
  0x2f   : > { %v398_v53 = vmul.f32 %v395_v41, %v2006_v4  ;;  %v399_v54 = vmul.f32 %v395_v41, %v2009_v5  ;;  %v400_v55 = vmul.f32 %v395_v41, %v2013_v7  ;;  %v401_v56 = vmul.f32 %v395_v41, %v2016_v8  ;;  %s2255_s22 = sld [smem:[#allocation2 + $0x100]] }
  0x30   : > { %v402_v57 = vmul.f32 %v395_v41, %v2019_v9  ;;  %v403_v58 = vmul.f32 %v395_v41, %v2026_v14  ;;  %v1595_v59 = vrot.slane %v396_v51, 9  ;;  %v1596_v60 = vrot.slane %v397_v52, 9  ;;  %s2278_s23 = sld [smem:[#allocation6 + $0x100]] }
  0x31   : > { %v1597_v61 = vrot.slane %v398_v53, 9  ;;  %v1598_v62 = vrot.slane %v399_v54, 9  ;;  %v392_v63 = vadd.f32 %v1592_v43, %v332_v17  ;;  %v393_v0 = vadd.f32 %v1593_v44, %v333_v19  ;;  %s2280_s24 = sld [smem:[#allocation2 + $0x101]] }
  0x32   : > { %v1599_v2 = vrot.slane %v400_v55, 9  ;;  %v1600_v6 = vrot.slane %v401_v56, 9  ;;  %v1601_v10 = vrot.slane %v402_v57, 9  ;;  %v1602_v11 = vrot.slane %v403_v58, 9  ;;  %s2282_s26 = sld [smem:[#allocation6 + $0x101]] }
  0x33   : > { %v436_v12 = vadd.f32 %v1595_v59, %v336_v13  ;;  %v437_v15 = vadd.f32 %v1596_v60, %v337_v18  ;;  %v438_v16 = vadd.f32 %v1597_v61, %v338_v20  ;;  %v439_v26 = vadd.f32 %v1598_v62, %v339_v21  ;;  %s2356_s28 = sld [smem:[#allocation2 + $0x102]] }
  0x34   : > { %v440_v27 = vadd.f32 %v1599_v2, %v340_v22  ;;  %v441_v28 = vadd.f32 %v1600_v6, %v341_v23  ;;  %v446_v29 = vmul.f32 %v445_v42, %v1998_v1  ;;  %v447_v30 = vmul.f32 %v445_v42, %v2003_v3  ;;  %s2362_s18 = sld [smem:[#allocation4 + $0x2]] }
  0x35   : > { %v448_v17 = vmul.f32 %v445_v42, %v2006_v4  ;;  %v449_v19 = vmul.f32 %v445_v42, %v2009_v5  ;;  %v450_v31 = vmul.f32 %v445_v42, %v2013_v7  ;;  %v451_v32 = vmul.f32 %v445_v42, %v2016_v8  ;;  %s2372_s25 = sld [smem:[#allocation7 + $0x2]] }
  0x36   : > { %v452_v13 = vmul.f32 %v445_v42, %v2019_v9  ;;  %v453_v18 = vmul.f32 %v445_v42, %v2026_v14  ;;  %v1604_v20 = vrot.slane %v446_v29, 10  ;;  %v1605_v21 = vrot.slane %v447_v30, 10 }
  0x37   : > { %v1606_v22 = vrot.slane %v448_v17, 10  ;;  %v1607_v23 = vrot.slane %v449_v19, 10  ;;  %v1608_v33 = vrot.slane %v450_v31, 10  ;;  %v1609_v34 = vrot.slane %v451_v32, 10 }
  0x38   : > { %v1610_v35 = vrot.slane %v452_v13, 10  ;;  %v1611_v36 = vrot.slane %v453_v18, 10  ;;  %v442_v37 = vadd.f32 %v1601_v10, %v2038_v24  ;;  %v443_v38 = vadd.f32 %v1602_v11, %v2041_v25 }
  0x39   : > { %v486_v39 = vadd.f32 %v1604_v20, %v386_v45  ;;  %v487_v40 = vadd.f32 %v1605_v21, %v387_v46  ;;  %v488_v41 = vadd.f32 %v1606_v22, %v388_v47  ;;  %v489_v42 = vadd.f32 %v1607_v23, %v389_v48 }
  0x3a   : > { %v490_v43 = vadd.f32 %v1608_v33, %v390_v49  ;;  %v491_v44 = vadd.f32 %v1609_v34, %v391_v50  ;;  %v492_v51 = vadd.f32 %v1610_v35, %v392_v63  ;;  %v493_v52 = vadd.f32 %v1611_v36, %v393_v0 }
  0x3b   : > { %v495_v53 = vstv %s2062_s30  ;;  %v545_v54 = vstv %s2064_s6  ;;  %v555_v62 = vstv %s2074_s7 }
  0x3c   : > { %v496_v55 = vmul.f32 %v495_v53, %v1998_v1  ;;  %v497_v56 = vmul.f32 %v495_v53, %v2003_v3  ;;  %v498_v57 = vmul.f32 %v495_v53, %v2006_v4  ;;  %v499_v24 = vmul.f32 %v495_v53, %v2009_v5 }
  0x3d   : > { %v500_v25 = vmul.f32 %v495_v53, %v2013_v7  ;;  %v501_v45 = vmul.f32 %v495_v53, %v2016_v8  ;;  %v502_v46 = vmul.f32 %v495_v53, %v2019_v9  ;;  %v503_v47 = vmul.f32 %v495_v53, %v2026_v14 }
  0x3e   : > { %v1613_v48 = vrot.slane %v496_v55, 10  ;;  %v1614_v49 = vrot.slane %v497_v56, 10  ;;  %v1615_v50 = vrot.slane %v498_v57, 10  ;;  %v1616_v58 = vrot.slane %v499_v24, 10 }
  0x3f   : > { %v1617_v59 = vrot.slane %v500_v25, 10  ;;  %v1618_v60 = vrot.slane %v501_v45, 10  ;;  %v1619_v61 = vrot.slane %v502_v46, 10  ;;  %v1620_v63 = vrot.slane %v503_v47, 10 }
  0x40   : > { %v536_v0 = vadd.f32 %v1613_v48, %v436_v12  ;;  %v537_v2 = vadd.f32 %v1614_v49, %v437_v15  ;;  %v538_v6 = vadd.f32 %v1615_v50, %v438_v16  ;;  %v539_v10 = vadd.f32 %v1616_v58, %v439_v26 }
  0x41   : > { %v540_v11 = vadd.f32 %v1617_v59, %v440_v27  ;;  %v541_v29 = vadd.f32 %v1618_v60, %v441_v28  ;;  %v542_v30 = vadd.f32 %v1619_v61, %v442_v37  ;;  %v546_v17 = vadd.f32 %v545_v54, %v486_v39 }
  0x42   : > { %v547_v19 = vadd.f32 %v545_v54, %v487_v40  ;;  %v548_v31 = vadd.f32 %v545_v54, %v488_v41  ;;  %v549_v32 = vadd.f32 %v545_v54, %v489_v42  ;;  %v550_v13 = vadd.f32 %v545_v54, %v490_v43 }
  0x43   : > { %v551_v18 = vadd.f32 %v545_v54, %v491_v44  ;;  %v552_v20 = vadd.f32 %v545_v54, %v492_v51  ;;  %v553_v21 = vadd.f32 %v545_v54, %v493_v52  ;;  %v543_v22 = vadd.f32 %v1620_v63, %v443_v38 }
  0x44   : > { %v2089_v23 = vadd.f32 %v555_v62, %v536_v0  ;;  %v2091_v33 = vadd.f32 %v555_v62, %v537_v2  ;;  %v2093_v12 = vadd.f32 %v555_v62, %v538_v6  ;;  %v2095_v15 = vadd.f32 %v555_v62, %v539_v10 }
  0x45   : > { %v2097_v16 = vadd.f32 %v555_v62, %v540_v11  ;;  %v2099_v26 = vadd.f32 %v555_v62, %v541_v29  ;;  %v2101_v27 = vadd.f32 %v555_v62, %v542_v30  ;;  %v564_v28 = vadd.f32 3.0, %v546_v17 }
  0x46   : > { %v565_v34 = vadd.f32 3.0, %v547_v19  ;;  %v566_v35 = vadd.f32 3.0, %v548_v31  ;;  %v567_v36 = vadd.f32 3.0, %v549_v32  ;;  %v568_v37 = vadd.f32 3.0, %v550_v13 }
  0x47   : > { %v569_v38 = vadd.f32 3.0, %v551_v18  ;;  %v570_v39 = vadd.f32 3.0, %v552_v20  ;;  %v571_v40 = vadd.f32 3.0, %v553_v21  ;;  %v572_v41 = vmax.f32 %v564_v28, 0.0 }
  0x48   : > { %v573_v42 = vmax.f32 %v565_v34, 0.0  ;;  %v574_v43 = vmax.f32 %v566_v35, 0.0  ;;  %v575_v44 = vmax.f32 %v567_v36, 0.0  ;;  %v576_v51 = vmax.f32 %v568_v37, 0.0 }
  0x49   : > { %v577_v52 = vmax.f32 %v569_v38, 0.0  ;;  %v578_v53 = vmax.f32 %v570_v39, 0.0  ;;  %v579_v54 = vmax.f32 %v571_v40, 0.0  ;;  %v580_v55 = vmin.f32 %v572_v41, 6.0 }
  0x4a   : > { %v581_v56 = vmin.f32 %v573_v42, 6.0  ;;  %v582_v57 = vmin.f32 %v574_v43, 6.0  ;;  %v583_v24 = vmin.f32 %v575_v44, 6.0  ;;  %v584_v25 = vmin.f32 %v576_v51, 6.0 }
  0x4b   : > { %v585_v45 = vmin.f32 %v577_v52, 6.0  ;;  %v586_v46 = vmin.f32 %v578_v53, 6.0  ;;  %v587_v47 = vmin.f32 %v579_v54, 6.0  ;;  %v588_v48 = vmul.f32 %v580_v55, %v546_v17 }
  0x4c   : > { %v589_v49 = vmul.f32 %v581_v56, %v547_v19  ;;  %v590_v50 = vmul.f32 %v582_v57, %v548_v31  ;;  %v591_v58 = vmul.f32 %v583_v24, %v549_v32  ;;  %v592_v59 = vmul.f32 %v584_v25, %v550_v13 }
  0x4d   : > { %v593_v60 = vmul.f32 %v585_v45, %v551_v18  ;;  %v594_v61 = vmul.f32 %v586_v46, %v552_v20  ;;  %v595_v63 = vmul.f32 %v587_v47, %v553_v21  ;;  %v563_v0 = vadd.f32 %v555_v62, %v543_v22 }
  0x4e   : > { %v596_v2 = vmul.f32 0.16666667, %v588_v48  ;;  %v597_v6 = vmul.f32 0.16666667, %v589_v49  ;;  %v598_v10 = vmul.f32 0.16666667, %v590_v50 }
  0x4f   : > { %v599_v11 = vmul.f32 0.16666667, %v591_v58  ;;  %v600_v29 = vmul.f32 0.16666667, %v592_v59  ;;  %v601_v30 = vmul.f32 0.16666667, %v593_v60  ;;  %v2120_v60 = vstv %s2109_s8 }
  0x50   : > { %v602_v28 = vmul.f32 0.16666667, %v594_v61  ;;  %v603_v34 = vmul.f32 0.16666667, %v595_v63  ;;  %v604_v35 = vadd.f32 3.0, %v2089_v23  ;;  %v605_v17 = vadd.f32 3.0, %v2091_v33 }
  0x51   : > { %v606_v19 = vadd.f32 3.0, %v2093_v12  ;;  %v607_v31 = vadd.f32 3.0, %v2095_v15  ;;  %v608_v32 = vadd.f32 3.0, %v2097_v16  ;;  %v609_v62 = vadd.f32 3.0, %v2099_v26 }
  0x52   : > { %v610_v13 = vadd.f32 3.0, %v2101_v27  ;;  %v611_v18 = vadd.f32 3.0, %v563_v0  ;;  %v612_v20 = vmax.f32 %v604_v35, 0.0  ;;  %v613_v21 = vmax.f32 %v605_v17, 0.0 }
  0x53   : > { %v614_v22 = vmax.f32 %v606_v19, 0.0  ;;  %v615_v36 = vmax.f32 %v607_v31, 0.0  ;;  %v616_v37 = vmax.f32 %v608_v32, 0.0  ;;  %v617_v38 = vmax.f32 %v609_v62, 0.0 }
  0x54   : > { %v618_v39 = vmax.f32 %v610_v13, 0.0  ;;  %v619_v40 = vmax.f32 %v611_v18, 0.0  ;;  %v620_v41 = vmin.f32 %v612_v20, 6.0  ;;  %v621_v42 = vmin.f32 %v613_v21, 6.0 }
  0x55   : > { %v622_v43 = vmin.f32 %v614_v22, 6.0  ;;  %v623_v44 = vmin.f32 %v615_v36, 6.0  ;;  %v624_v51 = vmin.f32 %v616_v37, 6.0  ;;  %v625_v52 = vmin.f32 %v617_v38, 6.0 }
  0x56   : > { %v626_v53 = vmin.f32 %v618_v39, 6.0  ;;  %v627_v54 = vmin.f32 %v619_v40, 6.0  ;;  %v628_v55 = vmul.f32 %v620_v41, %v2089_v23  ;;  %v629_v56 = vmul.f32 %v621_v42, %v2091_v33 }
  0x57   : > { %v630_v57 = vmul.f32 %v622_v43, %v2093_v12  ;;  %v631_v24 = vmul.f32 %v623_v44, %v2095_v15  ;;  %v632_v25 = vmul.f32 %v624_v51, %v2097_v16  ;;  %v633_v45 = vmul.f32 %v625_v52, %v2099_v26 }
  0x58   : > { %v634_v46 = vmul.f32 %v626_v53, %v2101_v27  ;;  %v635_v47 = vmul.f32 %v627_v54, %v563_v0  ;;  %v636_v48 = vmul.f32 0.16666667, %v628_v55  ;;  %v637_v49 = vmul.f32 0.16666667, %v629_v56 }
  0x59   : > { %v638_v50 = vmul.f32 0.16666667, %v630_v57  ;;  %v639_v58 = vmul.f32 0.16666667, %v631_v24  ;;  %v640_v59 = vmul.f32 0.16666667, %v632_v25  ;;  %v702_v51 = vmul.f32 %v2120_v60, %v1998_v1 }
  0x5a   : > { %v641_v23 = vmul.f32 0.16666667, %v633_v45  ;;  %v642_v33 = vmul.f32 0.16666667, %v634_v46  ;;  %v643_v61 = vmul.f32 0.16666667, %v635_v47  ;;  %v644_v12 = vadd.f32 %v636_v48, %v596_v2 }
  0x5b   : > { %v645_v63 = vadd.f32 %v637_v49, %v597_v6  ;;  %v646_v15 = vadd.f32 %v638_v50, %v598_v10  ;;  %v647_v35 = vadd.f32 %v639_v58, %v599_v11  ;;  %v648_v16 = vadd.f32 %v640_v59, %v600_v29 }
  0x5c   : > { %v649_v17 = vadd.f32 %v641_v23, %v601_v30  ;;  %v650_v26 = vadd.f32 %v642_v33, %v602_v28  ;;  %v651_v19 = vadd.f32 %v643_v61, %v603_v34  ;;  %v660_v27 = vrot.slane %v644_v12, 3 }
  0x5d   : > { %v661_v0 = vrot.slane %v645_v63, 6  ;;  %v662_v31 = vrot.slane %v645_v63, 1  ;;  %v663_v32 = vrot.slane %v646_v15, 4  ;;  %v664_v62 = vrot.slane %v646_v15, 7 }
  0x5e   : > { %v665_v13 = vrot.slane %v647_v35, 2  ;;  %v666_v18 = vrot.slane %v647_v35, 5  ;;  %v667_v20 = vrot.slane %v648_v16, 3  ;;  %v668_v21 = vrot.slane %v649_v17, 6 }
  0x5f   : > { %v669_v2 = vrot.slane %v649_v17, 1  ;;  %v670_v6 = vrot.slane %v650_v26, 4  ;;  %v671_v10 = vrot.slane %v650_v26, 7  ;;  %v672_v11 = vrot.slane %v651_v19, 2 }
  0x60   : > { %v673_v29 = vrot.slane %v651_v19, 5  ;;  %v675_v30 = vsel %vm674_vm0, %v644_v12, %v660_v27  ;;  %v677_v28 = vsel %vm676_vm1, %v661_v0, %v662_v31  ;;  %v681_v22 = vsel %vm680_vm3, %v663_v32, %v664_v62 }
  0x61   : > { %v679_v34 = vsel %vm678_vm2, %v675_v30, %v677_v28  ;;  %v683_v36 = vsel %vm682_vm4, %v665_v13, %v666_v18  ;;  %v688_v38 = vsel %vm674_vm0, %v648_v16, %v667_v20  ;;  %v689_v39 = vsel %vm676_vm1, %v668_v21, %v669_v2 }
  0x62   : > { %v685_v37 = vsel %vm684_vm5, %v681_v22, %v683_v36  ;;  %v690_v41 = vsel %vm678_vm2, %v688_v38, %v689_v39  ;;  %v691_v42 = vsel %vm680_vm3, %v670_v6, %v671_v10  ;;  %v692_v43 = vsel %vm682_vm4, %v672_v11, %v673_v29 }
  0x63   : > { %v687_v40 = vsel %vm686_vm6, %v679_v34, %v685_v37  ;;  %v693_v44 = vsel %vm684_vm5, %v691_v42, %v692_v43  ;;  %v703_v52 = vmul.f32 %v2120_v60, %v2003_v3  ;;  %v704_v53 = vmul.f32 %v2120_v60, %v2006_v4 }
  0x64   : > { %697 = vst [vmem:[%s2133_s13] ss:$4 sm:$0xff] %v687_v40  ;;  %v694_v54 = vsel %vm686_vm6, %v690_v41, %v693_v44  ;;  %v705_v55 = vmul.f32 %v2120_v60, %v2009_v5  ;;  %v706_v56 = vmul.f32 %v2120_v60, %v2013_v7  ;;  %v711_v57 = vstv %s2122_s9 }
  0x65   : > { %1621 = vst [vmem:[%s2133_s13 + $0x20] ss:$4 sm:$0xff] %v694_v54  ;;  %v707_v24 = vmul.f32 %v2120_v60, %v2016_v8  ;;  %v708_v25 = vmul.f32 %v2120_v60, %v2019_v9  ;;  %v709_v45 = vmul.f32 %v2120_v60, %v2026_v14  ;;  %v712_v46 = vmul.f32 %v711_v57, %v1998_v1 }
  0x66   : > { %v713_v47 = vmul.f32 %v711_v57, %v2003_v3  ;;  %v714_v48 = vmul.f32 %v711_v57, %v2006_v4  ;;  %v715_v49 = vmul.f32 %v711_v57, %v2009_v5  ;;  %v716_v50 = vmul.f32 %v711_v57, %v2013_v7 }
  0x67   : > { %v2178_v58 = vmul.f32 %v711_v57, %v2016_v8  ;;  %v2181_v59 = vmul.f32 %v711_v57, %v2019_v9  ;;  %v2184_v23 = vmul.f32 %v711_v57, %v2026_v14  ;;  %v721_v60 = vstv %s2126_s10 }
  0x68   : > { %v722_v33 = vmul.f32 %v721_v60, %v1998_v1  ;;  %v723_v61 = vmul.f32 %v721_v60, %v2003_v3  ;;  %v724_v12 = vmul.f32 %v721_v60, %v2006_v4  ;;  %v725_v63 = vmul.f32 %v721_v60, %v2009_v5 }
  0x69   : > { %v726_v15 = vmul.f32 %v721_v60, %v2013_v7  ;;  %v727_v35 = vmul.f32 %v721_v60, %v2016_v8  ;;  %v728_v16 = vmul.f32 %v721_v60, %v2019_v9  ;;  %v729_v17 = vmul.f32 %v721_v60, %v2026_v14 }
  0x6a   : > { %v1625_v26 = vrot.slane %v722_v33, 9  ;;  %v1626_v19 = vrot.slane %v723_v61, 9  ;;  %v1627_v27 = vrot.slane %v724_v12, 9  ;;  %v1628_v0 = vrot.slane %v725_v63, 9 }
  0x6b   : > { %v1629_v31 = vrot.slane %v726_v15, 9  ;;  %v771_v32 = vstv %s2141_s14  ;;  %v821_v62 = vstv %s2147_s15  ;;  %v2198_v13 = vstv %s2157_s16 }
  0x6c   : > { %v1630_v18 = vrot.slane %v727_v35, 9  ;;  %v1631_v20 = vrot.slane %v728_v16, 9  ;;  %v1632_v21 = vrot.slane %v729_v17, 9  ;;  %v762_v2 = vadd.f32 %v1625_v26, %v702_v51 }
  0x6d   : > { %v763_v6 = vadd.f32 %v1626_v19, %v703_v52  ;;  %v764_v10 = vadd.f32 %v1627_v27, %v704_v53  ;;  %v765_v11 = vadd.f32 %v1628_v0, %v705_v55  ;;  %v766_v29 = vadd.f32 %v1629_v31, %v706_v56 }
  0x6e   : > { %v772_v30 = vmul.f32 %v771_v32, %v1998_v1  ;;  %v773_v28 = vmul.f32 %v771_v32, %v2003_v3  ;;  %v774_v34 = vmul.f32 %v771_v32, %v2006_v4  ;;  %v775_v22 = vmul.f32 %v771_v32, %v2009_v5 }
  0x6f   : > { %v776_v36 = vmul.f32 %v771_v32, %v2013_v7  ;;  %v777_v37 = vmul.f32 %v771_v32, %v2016_v8  ;;  %v778_v38 = vmul.f32 %v771_v32, %v2019_v9  ;;  %v779_v39 = vmul.f32 %v771_v32, %v2026_v14 }
  0x70   : > { %v1634_v40 = vrot.slane %v772_v30, 9  ;;  %v1635_v41 = vrot.slane %v773_v28, 9  ;;  %v1636_v42 = vrot.slane %v774_v34, 9  ;;  %v1637_v43 = vrot.slane %v775_v22, 9 }
  0x71   : > { %v767_v44 = vadd.f32 %v1630_v18, %v707_v24  ;;  %v768_v51 = vadd.f32 %v1631_v20, %v708_v25  ;;  %v769_v52 = vadd.f32 %v1632_v21, %v709_v45  ;;  %v1638_v53 = vrot.slane %v776_v36, 9 }
  0x72   : > { %v1639_v54 = vrot.slane %v777_v37, 9  ;;  %v1640_v55 = vrot.slane %v778_v38, 9  ;;  %v1641_v56 = vrot.slane %v779_v39, 9  ;;  %v812_v57 = vadd.f32 %v1634_v40, %v712_v46 }
  0x73   : > { %v813_v60 = vadd.f32 %v1635_v41, %v713_v47  ;;  %v814_v33 = vadd.f32 %v1636_v42, %v714_v48  ;;  %v815_v61 = vadd.f32 %v1637_v43, %v715_v49  ;;  %v816_v12 = vadd.f32 %v1638_v53, %v716_v50 }
  0x74   : > { %v822_v63 = vmul.f32 %v821_v62, %v1998_v1  ;;  %v823_v15 = vmul.f32 %v821_v62, %v2003_v3  ;;  %v824_v35 = vmul.f32 %v821_v62, %v2006_v4  ;;  %v825_v16 = vmul.f32 %v821_v62, %v2009_v5 }
  0x75   : > { %v826_v24 = vmul.f32 %v821_v62, %v2013_v7  ;;  %v827_v25 = vmul.f32 %v821_v62, %v2016_v8  ;;  %v828_v45 = vmul.f32 %v821_v62, %v2019_v9  ;;  %v829_v46 = vmul.f32 %v821_v62, %v2026_v14 }
  0x76   : > { %v1643_v47 = vrot.slane %v822_v63, 10  ;;  %v1644_v48 = vrot.slane %v823_v15, 10  ;;  %v1645_v49 = vrot.slane %v824_v35, 10  ;;  %v1646_v50 = vrot.slane %v825_v16, 10 }
  0x77   : > { %v817_v17 = vadd.f32 %v1639_v54, %v2178_v58  ;;  %v818_v26 = vadd.f32 %v1640_v55, %v2181_v59  ;;  %v819_v19 = vadd.f32 %v1641_v56, %v2184_v23  ;;  %v1647_v27 = vrot.slane %v826_v24, 10 }
  0x78   : > { %v1648_v0 = vrot.slane %v827_v25, 10  ;;  %v1649_v31 = vrot.slane %v828_v45, 10  ;;  %v1650_v32 = vrot.slane %v829_v46, 10  ;;  %v862_v18 = vadd.f32 %v1643_v47, %v762_v2 }
  0x79   : > { %v863_v62 = vadd.f32 %v1644_v48, %v763_v6  ;;  %v864_v20 = vadd.f32 %v1645_v49, %v764_v10  ;;  %v865_v21 = vadd.f32 %v1646_v50, %v765_v11  ;;  %v866_v30 = vadd.f32 %v1647_v27, %v766_v29 }
  0x7a   : > { %v872_v58 = vmul.f32 %v2198_v13, %v1998_v1  ;;  %v873_v59 = vmul.f32 %v2198_v13, %v2003_v3  ;;  %v874_v23 = vmul.f32 %v2198_v13, %v2006_v4  ;;  %v875_v28 = vmul.f32 %v2198_v13, %v2009_v5 }
  0x7b   : > { %v876_v2 = vmul.f32 %v2198_v13, %v2013_v7  ;;  %v877_v6 = vmul.f32 %v2198_v13, %v2016_v8  ;;  %v878_v10 = vmul.f32 %v2198_v13, %v2019_v9  ;;  %v879_v11 = vmul.f32 %v2198_v13, %v2026_v14 }
  0x7c   : > { %v1652_v29 = vrot.slane %v872_v58, 10  ;;  %v1653_v3 = vrot.slane %v873_v59, 10  ;;  %v1654_v34 = vrot.slane %v874_v23, 10  ;;  %v1655_v4 = vrot.slane %v875_v28, 10 }
  0x7d   : > { %v867_v22 = vadd.f32 %v1648_v0, %v767_v44  ;;  %v1656_v5 = vrot.slane %v876_v2, 10  ;;  %v1657_v36 = vrot.slane %v877_v6, 10  ;;  %v1658_v37 = vrot.slane %v878_v10, 10 }
  0x7e   : > { %v868_v7 = vadd.f32 %v1649_v31, %v768_v51  ;;  %v869_v38 = vadd.f32 %v1650_v32, %v769_v52  ;;  %v1659_v39 = vrot.slane %v879_v11, 10  ;;  %v912_v8 = vadd.f32 %v1652_v29, %v812_v57 }
  0x7f   : > { %v913_v40 = vadd.f32 %v1653_v3, %v813_v60  ;;  %v914_v41 = vadd.f32 %v1654_v34, %v814_v33  ;;  %v915_v9 = vadd.f32 %v1655_v4, %v815_v61  ;;  %v916_v42 = vadd.f32 %v1656_v5, %v816_v12 }
  0x80   : > { %v917_v43 = vadd.f32 %v1657_v36, %v817_v17  ;;  %v918_v14 = vadd.f32 %v1658_v37, %v818_v26  ;;  %v921_v13 = vstv %s2219_s17  ;;  %v931_v53 = vstv %s2221_s21 }
  0x81   : > { %v922_v54 = vadd.f32 %v921_v13, %v862_v18  ;;  %v923_v55 = vadd.f32 %v921_v13, %v863_v62  ;;  %v924_v56 = vadd.f32 %v921_v13, %v864_v20  ;;  %v925_v63 = vadd.f32 %v921_v13, %v865_v21 }
  0x82   : > { %v926_v44 = vadd.f32 %v921_v13, %v866_v30  ;;  %v927_v15 = vadd.f32 %v921_v13, %v867_v22  ;;  %v928_v35 = vadd.f32 %v921_v13, %v868_v7  ;;  %v929_v16 = vadd.f32 %v921_v13, %v869_v38 }
  0x83   : > { %v919_v51 = vadd.f32 %v1659_v39, %v819_v19  ;;  %v2241_v52 = vadd.f32 %v931_v53, %v912_v8  ;;  %v2243_v57 = vadd.f32 %v931_v53, %v913_v40  ;;  %v2245_v60 = vadd.f32 %v931_v53, %v914_v41 }
  0x84   : > { %v2247_v33 = vadd.f32 %v931_v53, %v915_v9  ;;  %v2249_v61 = vadd.f32 %v931_v53, %v916_v42  ;;  %v2251_v12 = vadd.f32 %v931_v53, %v917_v43  ;;  %v2253_v24 = vadd.f32 %v931_v53, %v918_v14 }
  0x85   : > { %v940_v25 = vadd.f32 3.0, %v922_v54  ;;  %v941_v45 = vadd.f32 3.0, %v923_v55  ;;  %v942_v46 = vadd.f32 3.0, %v924_v56  ;;  %v943_v47 = vadd.f32 3.0, %v925_v63 }
  0x86   : > { %v944_v48 = vadd.f32 3.0, %v926_v44  ;;  %v945_v49 = vadd.f32 3.0, %v927_v15  ;;  %v946_v50 = vadd.f32 3.0, %v928_v35  ;;  %v947_v17 = vadd.f32 3.0, %v929_v16 }
  0x87   : > { %v948_v26 = vmax.f32 %v940_v25, 0.0  ;;  %v949_v19 = vmax.f32 %v941_v45, 0.0  ;;  %v950_v27 = vmax.f32 %v942_v46, 0.0  ;;  %v951_v0 = vmax.f32 %v943_v47, 0.0 }
  0x88   : > { %v952_v31 = vmax.f32 %v944_v48, 0.0  ;;  %v953_v32 = vmax.f32 %v945_v49, 0.0  ;;  %v954_v18 = vmax.f32 %v946_v50, 0.0  ;;  %v955_v62 = vmax.f32 %v947_v17, 0.0 }
  0x89   : > { %v956_v20 = vmin.f32 %v948_v26, 6.0  ;;  %v957_v21 = vmin.f32 %v949_v19, 6.0  ;;  %v958_v30 = vmin.f32 %v950_v27, 6.0  ;;  %v959_v58 = vmin.f32 %v951_v0, 6.0 }
  0x8a   : > { %v960_v59 = vmin.f32 %v952_v31, 6.0  ;;  %v961_v23 = vmin.f32 %v953_v32, 6.0  ;;  %v962_v28 = vmin.f32 %v954_v18, 6.0  ;;  %v963_v2 = vmin.f32 %v955_v62, 6.0 }
  0x8b   : > { %v964_v6 = vmul.f32 %v956_v20, %v922_v54  ;;  %v965_v10 = vmul.f32 %v957_v21, %v923_v55  ;;  %v966_v11 = vmul.f32 %v958_v30, %v924_v56  ;;  %v967_v29 = vmul.f32 %v959_v58, %v925_v63 }
  0x8c   : > { %v968_v3 = vmul.f32 %v960_v59, %v926_v44  ;;  %v969_v34 = vmul.f32 %v961_v23, %v927_v15  ;;  %v970_v4 = vmul.f32 %v962_v28, %v928_v35  ;;  %v971_v22 = vmul.f32 %v963_v2, %v929_v16 }
  0x8d   : > { %v939_v5 = vadd.f32 %v931_v53, %v919_v51  ;;  %v972_v36 = vmul.f32 0.16666667, %v964_v6  ;;  %v973_v37 = vmul.f32 0.16666667, %v965_v10  ;;  %v974_v7 = vmul.f32 0.16666667, %v966_v11 }
  0x8e   : > { %v975_v38 = vmul.f32 0.16666667, %v967_v29  ;;  %v976_v39 = vmul.f32 0.16666667, %v968_v3  ;;  %v977_v8 = vmul.f32 0.16666667, %v969_v34  ;;  %v2258_v40 = vstv %s2255_s22 }
  0x8f   : > { %v978_v41 = vmul.f32 0.16666667, %v970_v4  ;;  %v979_v9 = vmul.f32 0.16666667, %v971_v22  ;;  %v980_v42 = vadd.f32 3.0, %v2241_v52  ;;  %v981_v43 = vadd.f32 3.0, %v2243_v57 }
  0x90   : > { %v982_v14 = vadd.f32 3.0, %v2245_v60  ;;  %v983_v13 = vadd.f32 3.0, %v2247_v33  ;;  %v984_v53 = vadd.f32 3.0, %v2249_v61  ;;  %v985_v54 = vadd.f32 3.0, %v2251_v12 }
  0x91   : > { %v986_v55 = vadd.f32 3.0, %v2253_v24  ;;  %v987_v56 = vadd.f32 3.0, %v939_v5  ;;  %v988_v63 = vmax.f32 %v980_v42, 0.0  ;;  %v989_v44 = vmax.f32 %v981_v43, 0.0 }
  0x92   : > { %v990_v15 = vmax.f32 %v982_v14, 0.0  ;;  %v991_v35 = vmax.f32 %v983_v13, 0.0  ;;  %v992_v16 = vmax.f32 %v984_v53, 0.0  ;;  %v993_v51 = vmax.f32 %v985_v54, 0.0 }
  0x93   : > { %v994_v25 = vmax.f32 %v986_v55, 0.0  ;;  %v995_v45 = vmax.f32 %v987_v56, 0.0  ;;  %v996_v46 = vmin.f32 %v988_v63, 6.0  ;;  %v997_v47 = vmin.f32 %v989_v44, 6.0 }
  0x94   : > { %v998_v48 = vmin.f32 %v990_v15, 6.0  ;;  %v999_v49 = vmin.f32 %v991_v35, 6.0  ;;  %v1000_v50 = vmin.f32 %v992_v16, 6.0  ;;  %v1001_v17 = vmin.f32 %v993_v51, 6.0  ;;  %v2298_v51 = vld [vmem:[%s1993_s29 + $0x8] sm:$0x77] }
  0x95   : > { %v1002_v26 = vmin.f32 %v994_v25, 6.0  ;;  %v1003_v19 = vmin.f32 %v995_v45, 6.0  ;;  %v1004_v27 = vmul.f32 %v996_v46, %v2241_v52  ;;  %v1005_v0 = vmul.f32 %v997_v47, %v2243_v57  ;;  %v2303_v45 = vld [vmem:[%s1993_s29 + $0x10] sm:$0x77] }
  0x96   : > { %v1006_v31 = vmul.f32 %v998_v48, %v2245_v60  ;;  %v1007_v32 = vmul.f32 %v999_v49, %v2247_v33  ;;  %v1008_v18 = vmul.f32 %v1000_v50, %v2249_v61  ;;  %v1009_v62 = vmul.f32 %v1001_v17, %v2251_v12  ;;  %v2310_v48 = vld [vmem:[%s1993_s29 + $0x18] sm:$0x77]  ;;  %v2315_v50 = vld [vmem:[%s1993_s29 + $0x20] sm:$0x77] }
  0x97   : > { %v1010_v20 = vmul.f32 %v1002_v26, %v2253_v24  ;;  %v1011_v21 = vmul.f32 %v1003_v19, %v939_v5  ;;  %v1012_v30 = vmul.f32 0.16666667, %v1004_v27  ;;  %v1013_v58 = vmul.f32 0.16666667, %v1005_v0  ;;  %v2320_v26 = vld [vmem:[%s1993_s29 + $0x28] sm:$0x77] }
  0x98   : > { %v1014_v59 = vmul.f32 0.16666667, %v1006_v31  ;;  %v1015_v23 = vmul.f32 0.16666667, %v1007_v32  ;;  %v1016_v28 = vmul.f32 0.16666667, %v1008_v18  ;;  %v2276_v52 = vmul.f32 %v2258_v40, %v1998_v1 }
  0x99   : > { %v1017_v57 = vmul.f32 0.16666667, %v1009_v62  ;;  %v1018_v60 = vmul.f32 0.16666667, %v1010_v20  ;;  %v1019_v2 = vmul.f32 0.16666667, %v1011_v21  ;;  %v1020_v33 = vadd.f32 %v1012_v30, %v972_v36 }
  0x9a   : > { %v1021_v6 = vadd.f32 %v1013_v58, %v973_v37  ;;  %v1022_v61 = vadd.f32 %v1014_v59, %v974_v7  ;;  %v1023_v10 = vadd.f32 %v1015_v23, %v975_v38  ;;  %v1024_v12 = vadd.f32 %v1016_v28, %v976_v39  ;;  %v2326_v27 = vld [vmem:[%s1993_s29 + $0x30] sm:$0x77]  ;;  %v2331_v31 = vld [vmem:[%s1993_s29 + $0x38] sm:$0x77]  ;;  %v2338_v20 = vld [vmem:[%s1993_s29] sm:$0x77] }
  0x9b   : > { %v1025_v11 = vadd.f32 %v1017_v57, %v977_v8  ;;  %v1026_v24 = vadd.f32 %v1018_v60, %v978_v41  ;;  %v1027_v29 = vadd.f32 %v1019_v2, %v979_v9  ;;  %v1036_v3 = vrot.slane %v1020_v33, 3  ;;  %s2359_s29 = sld [smem:[#allocation6 + $0x102]] }
  0x9c   : > { %v1037_v34 = vrot.slane %v1021_v6, 6  ;;  %v1038_v4 = vrot.slane %v1021_v6, 1  ;;  %v1039_v22 = vrot.slane %v1022_v61, 4  ;;  %v1040_v5 = vrot.slane %v1022_v61, 7 }
  0x9d   : > { %v1041_v1 = vrot.slane %v1023_v10, 2  ;;  %v1042_v42 = vrot.slane %v1023_v10, 5  ;;  %v1043_v43 = vrot.slane %v1024_v12, 3  ;;  %v1044_v36 = vrot.slane %v1025_v11, 6 }
  0x9e   : > { %v1045_v37 = vrot.slane %v1025_v11, 1  ;;  %v1046_v7 = vrot.slane %v1026_v24, 4  ;;  %v1047_v38 = vrot.slane %v1026_v24, 7  ;;  %v1048_v39 = vrot.slane %v1027_v29, 2 }
  0x9f   : > { %v1049_v8 = vrot.slane %v1027_v29, 5  ;;  %v1050_v41 = vsel %vm674_vm0, %v1020_v33, %v1036_v3  ;;  %v1051_v9 = vsel %vm676_vm1, %v1037_v34, %v1038_v4  ;;  %v1053_v14 = vsel %vm680_vm3, %v1039_v22, %v1040_v5 }
  0xa0   : > { %v1052_v13 = vsel %vm678_vm2, %v1050_v41, %v1051_v9  ;;  %v1054_v53 = vsel %vm682_vm4, %v1041_v1, %v1042_v42  ;;  %v1057_v54 = vsel %vm674_vm0, %v1024_v12, %v1043_v43  ;;  %v1058_v55 = vsel %vm676_vm1, %v1044_v36, %v1045_v37 }
  0xa1   : > { %v1055_v56 = vsel %vm684_vm5, %v1053_v14, %v1054_v53  ;;  %v1059_v63 = vsel %vm678_vm2, %v1057_v54, %v1058_v55  ;;  %v1060_v44 = vsel %vm680_vm3, %v1046_v7, %v1047_v38  ;;  %v1061_v15 = vsel %vm682_vm4, %v1048_v39, %v1049_v8 }
  0xa2   : > { %v1056_v35 = vsel %vm686_vm6, %v1052_v13, %v1055_v56  ;;  %v1062_v16 = vsel %vm684_vm5, %v1060_v44, %v1061_v15  ;;  %v1073_v25 = vmul.f32 %v2298_v51, %v2258_v40  ;;  %v1074_v46 = vmul.f32 %v2303_v45, %v2258_v40 }
  0xa3   : > { %v1063_v47 = vsel %vm686_vm6, %v1059_v63, %v1062_v16  ;;  %1662 = vst [vmem:[%s2133_s13 + $0x1] ss:$4 sm:$0xff] %v1056_v35  ;;  %v1075_v49 = vmul.f32 %v2310_v48, %v2258_v40  ;;  %v1076_v17 = vmul.f32 %v2315_v50, %v2258_v40  ;;  %v1077_v19 = vmul.f32 %v2320_v26, %v2258_v40 }
  0xa4   : > { %1663 = vst [vmem:[%s2133_s13 + $0x21] ss:$4 sm:$0xff] %v1063_v47  ;;  %v1078_v0 = vmul.f32 %v2326_v27, %v2258_v40  ;;  %v1079_v32 = vmul.f32 %v2331_v31, %v2258_v40  ;;  %v1081_v18 = vstv %s2278_s23  ;;  %v1091_v62 = vstv %s2280_s24 }
  0xa5   : > { %v1082_v21 = vmul.f32 %v2338_v20, %v1081_v18  ;;  %v1083_v30 = vmul.f32 %v2298_v51, %v1081_v18  ;;  %v1084_v58 = vmul.f32 %v2303_v45, %v1081_v18  ;;  %v1141_v59 = vstv %s2282_s26 }
  0xa6   : > { %v1085_v23 = vmul.f32 %v2310_v48, %v1081_v18  ;;  %v1086_v28 = vmul.f32 %v2315_v50, %v1081_v18  ;;  %v1087_v57 = vmul.f32 %v2320_v26, %v1081_v18  ;;  %v1088_v60 = vmul.f32 %v2326_v27, %v1081_v18 }
  0xa7   : > { %v1092_v40 = vmul.f32 %v2338_v20, %v1091_v62  ;;  %v1093_v2 = vmul.f32 %v2298_v51, %v1091_v62  ;;  %v1094_v33 = vmul.f32 %v2303_v45, %v1091_v62  ;;  %v1095_v6 = vmul.f32 %v2310_v48, %v1091_v62 }
  0xa8   : > { %v1096_v61 = vmul.f32 %v2315_v50, %v1091_v62  ;;  %v1097_v10 = vmul.f32 %v2320_v26, %v1091_v62  ;;  %v1098_v12 = vmul.f32 %v2326_v27, %v1091_v62  ;;  %v1099_v11 = vmul.f32 %v2331_v31, %v1091_v62 }
  0xa9   : > { %v1667_v24 = vrot.slane %v1092_v40, 9  ;;  %v1668_v29 = vrot.slane %v1093_v2, 9  ;;  %v1669_v3 = vrot.slane %v1094_v33, 9  ;;  %v1670_v34 = vrot.slane %v1095_v6, 9 }
  0xaa   : > { %v1089_v4 = vmul.f32 %v2331_v31, %v1081_v18  ;;  %v1671_v22 = vrot.slane %v1096_v61, 9  ;;  %v1672_v5 = vrot.slane %v1097_v10, 9  ;;  %v1673_v1 = vrot.slane %v1098_v12, 9 }
  0xab   : > { %v1674_v42 = vrot.slane %v1099_v11, 9  ;;  %v1132_v43 = vadd.f32 %v1667_v24, %v2276_v52  ;;  %v1133_v36 = vadd.f32 %v1668_v29, %v1073_v25  ;;  %v1134_v37 = vadd.f32 %v1669_v3, %v1074_v46 }
  0xac   : > { %v1135_v7 = vadd.f32 %v1670_v34, %v1075_v49  ;;  %v1136_v38 = vadd.f32 %v1671_v22, %v1076_v17  ;;  %v1137_v39 = vadd.f32 %v1672_v5, %v1077_v19  ;;  %v1138_v8 = vadd.f32 %v1673_v1, %v1078_v0 }
  0xad   : > { %v1142_v41 = vmul.f32 %v2338_v20, %v1141_v59  ;;  %v1143_v9 = vmul.f32 %v2298_v51, %v1141_v59  ;;  %v1144_v14 = vmul.f32 %v2303_v45, %v1141_v59  ;;  %v1145_v13 = vmul.f32 %v2310_v48, %v1141_v59 }
  0xae   : > { %v1146_v53 = vmul.f32 %v2315_v50, %v1141_v59  ;;  %v1147_v52 = vmul.f32 %v2320_v26, %v1141_v59  ;;  %v1148_v54 = vmul.f32 %v2326_v27, %v1141_v59  ;;  %v1149_v55 = vmul.f32 %v2331_v31, %v1141_v59 }
  0xaf   : > { %v1676_v56 = vrot.slane %v1142_v41, 9  ;;  %v1677_v63 = vrot.slane %v1143_v9, 9  ;;  %v1678_v44 = vrot.slane %v1144_v14, 9  ;;  %v1679_v15 = vrot.slane %v1145_v13, 9 }
  0xb0   : > { %v1680_v35 = vrot.slane %v1146_v53, 9  ;;  %v1681_v16 = vrot.slane %v1147_v52, 9  ;;  %v1682_v25 = vrot.slane %v1148_v54, 9  ;;  %v1683_v46 = vrot.slane %v1149_v55, 9 }
  0xb1   : > { %v1139_v47 = vadd.f32 %v1674_v42, %v1079_v32  ;;  %v1182_v49 = vadd.f32 %v1676_v56, %v1082_v21  ;;  %v1183_v17 = vadd.f32 %v1677_v63, %v1083_v30  ;;  %v1184_v19 = vadd.f32 %v1678_v44, %v1084_v58 }
  0xb2   : > { %v1185_v0 = vadd.f32 %v1679_v15, %v1085_v23  ;;  %v1186_v18 = vadd.f32 %v1680_v35, %v1086_v28  ;;  %v1187_v62 = vadd.f32 %v1681_v16, %v1087_v57  ;;  %v1188_v59 = vadd.f32 %v1682_v25, %v1088_v60 }
  0xb3   : > { %v1189_v40 = vadd.f32 %v1683_v46, %v1089_v4  ;;  %v1191_v2 = vstv %s2356_s28  ;;  %v1241_v33 = vstv %s2359_s29  ;;  %v1291_v6 = vstv %s2362_s18 }
  0xb4   : > { %v1192_v61 = vmul.f32 %v2338_v20, %v1191_v2  ;;  %v1193_v10 = vmul.f32 %v2298_v51, %v1191_v2  ;;  %v1194_v12 = vmul.f32 %v2303_v45, %v1191_v2  ;;  %v1195_v32 = vmul.f32 %v2310_v48, %v1191_v2 }
  0xb5   : > { %v1196_v21 = vmul.f32 %v2315_v50, %v1191_v2  ;;  %v1197_v30 = vmul.f32 %v2320_v26, %v1191_v2  ;;  %v1198_v58 = vmul.f32 %v2326_v27, %v1191_v2  ;;  %v1199_v23 = vmul.f32 %v2331_v31, %v1191_v2 }
  0xb6   : > { %v1685_v28 = vrot.slane %v1192_v61, 10  ;;  %v1686_v57 = vrot.slane %v1193_v10, 10  ;;  %v1687_v60 = vrot.slane %v1194_v12, 10  ;;  %v1688_v11 = vrot.slane %v1195_v32, 10 }
  0xb7   : > { %v1689_v24 = vrot.slane %v1196_v21, 10  ;;  %v1690_v29 = vrot.slane %v1197_v30, 10  ;;  %v1691_v3 = vrot.slane %v1198_v58, 10  ;;  %v2386_v34 = vstv %s2372_s25 }
  0xb8   : > { %v1692_v4 = vrot.slane %v1199_v23, 10  ;;  %v1232_v22 = vadd.f32 %v1685_v28, %v1132_v43  ;;  %v1233_v5 = vadd.f32 %v1686_v57, %v1133_v36  ;;  %v1234_v1 = vadd.f32 %v1687_v60, %v1134_v37 }
  0xb9   : > { %v1235_v42 = vadd.f32 %v1688_v11, %v1135_v7  ;;  %v1236_v41 = vadd.f32 %v1689_v24, %v1136_v38  ;;  %v1237_v9 = vadd.f32 %v1690_v29, %v1137_v39  ;;  %v1238_v14 = vadd.f32 %v1691_v3, %v1138_v8 }
  0xba   : > { %v1242_v13 = vmul.f32 %v2338_v20, %v1241_v33  ;;  %v1243_v53 = vmul.f32 %v2298_v51, %v1241_v33  ;;  %v1244_v52 = vmul.f32 %v2303_v45, %v1241_v33  ;;  %v1245_v54 = vmul.f32 %v2310_v48, %v1241_v33 }
  0xbb   : > { %v1246_v55 = vmul.f32 %v2315_v50, %v1241_v33  ;;  %v1247_v56 = vmul.f32 %v2320_v26, %v1241_v33  ;;  %v1248_v43 = vmul.f32 %v2326_v27, %v1241_v33  ;;  %v1249_v36 = vmul.f32 %v2331_v31, %v1241_v33 }
  0xbc   : > { %v1694_v37 = vrot.slane %v1242_v13, 10  ;;  %v1695_v7 = vrot.slane %v1243_v53, 10  ;;  %v1696_v38 = vrot.slane %v1244_v52, 10  ;;  %v1697_v39 = vrot.slane %v1245_v54, 10 }
  0xbd   : > { %v1239_v8 = vadd.f32 %v1692_v4, %v1139_v47  ;;  %v1698_v20 = vrot.slane %v1246_v55, 10  ;;  %v1699_v63 = vrot.slane %v1247_v56, 10  ;;  %v1700_v51 = vrot.slane %v1248_v43, 10 }
  0xbe   : > { %v1701_v44 = vrot.slane %v1249_v36, 10  ;;  %v1282_v45 = vadd.f32 %v1694_v37, %v1182_v49  ;;  %v1283_v15 = vadd.f32 %v1695_v7, %v1183_v17  ;;  %v1284_v48 = vadd.f32 %v1696_v38, %v1184_v19 }
  0xbf   : > { %v1285_v35 = vadd.f32 %v1697_v39, %v1185_v0  ;;  %v1286_v50 = vadd.f32 %v1698_v20, %v1186_v18  ;;  %v1287_v16 = vadd.f32 %v1699_v63, %v1187_v62  ;;  %v1288_v26 = vadd.f32 %v1700_v51, %v1188_v59 }
  0xc0   : > { %v1292_v25 = vadd.f32 %v1291_v6, %v1232_v22  ;;  %v1293_v27 = vadd.f32 %v1291_v6, %v1233_v5  ;;  %v1294_v46 = vadd.f32 %v1291_v6, %v1234_v1  ;;  %v1295_v31 = vadd.f32 %v1291_v6, %v1235_v42 }
  0xc1   : > { %v1296_v2 = vadd.f32 %v1291_v6, %v1236_v41  ;;  %v1297_v33 = vadd.f32 %v1291_v6, %v1237_v9  ;;  %v1298_v61 = vadd.f32 %v1291_v6, %v1238_v14  ;;  %v1299_v10 = vadd.f32 %v1291_v6, %v1239_v8 }
  0xc2   : > { %v1289_v47 = vadd.f32 %v1701_v44, %v1189_v40  ;;  %v2397_v12 = vadd.f32 %v2386_v34, %v1282_v45  ;;  %v2400_v49 = vadd.f32 %v2386_v34, %v1283_v15  ;;  %v2403_v17 = vadd.f32 %v2386_v34, %v1284_v48 }
  0xc3   : > { %v2406_v19 = vadd.f32 %v2386_v34, %v1285_v35  ;;  %v2409_v0 = vadd.f32 %v2386_v34, %v1286_v50  ;;  %v2412_v18 = vadd.f32 %v2386_v34, %v1287_v16  ;;  %v2415_v62 = vadd.f32 %v2386_v34, %v1288_v26 }
  0xc4   : > { %v1310_v59 = vadd.f32 3.0, %v1292_v25  ;;  %v1311_v40 = vadd.f32 3.0, %v1293_v27  ;;  %v1312_v6 = vadd.f32 3.0, %v1294_v46  ;;  %v1313_v32 = vadd.f32 3.0, %v1295_v31 }
  0xc5   : > { %v1314_v21 = vadd.f32 3.0, %v1296_v2  ;;  %v1315_v30 = vadd.f32 3.0, %v1297_v33  ;;  %v1316_v58 = vadd.f32 3.0, %v1298_v61  ;;  %v1317_v23 = vadd.f32 3.0, %v1299_v10 }
  0xc6   : > { %v1318_v28 = vmax.f32 %v1310_v59, 0.0  ;;  %v1319_v57 = vmax.f32 %v1311_v40, 0.0  ;;  %v1320_v60 = vmax.f32 %v1312_v6, 0.0  ;;  %v1321_v11 = vmax.f32 %v1313_v32, 0.0 }
  0xc7   : > { %v1322_v24 = vmax.f32 %v1314_v21, 0.0  ;;  %v1323_v29 = vmax.f32 %v1315_v30, 0.0  ;;  %v1324_v3 = vmax.f32 %v1316_v58, 0.0  ;;  %v1325_v4 = vmax.f32 %v1317_v23, 0.0 }
  0xc8   : > { %v1326_v22 = vmin.f32 %v1318_v28, 6.0  ;;  %v1327_v5 = vmin.f32 %v1319_v57, 6.0  ;;  %v1328_v1 = vmin.f32 %v1320_v60, 6.0  ;;  %v1329_v42 = vmin.f32 %v1321_v11, 6.0 }
  0xc9   : > { %v1330_v41 = vmin.f32 %v1322_v24, 6.0  ;;  %v1331_v9 = vmin.f32 %v1323_v29, 6.0  ;;  %v1332_v14 = vmin.f32 %v1324_v3, 6.0  ;;  %v1333_v13 = vmin.f32 %v1325_v4, 6.0 }
  0xca   : > { %v1334_v53 = vmul.f32 %v1326_v22, %v1292_v25  ;;  %v1335_v52 = vmul.f32 %v1327_v5, %v1293_v27  ;;  %v1336_v54 = vmul.f32 %v1328_v1, %v1294_v46  ;;  %v1337_v55 = vmul.f32 %v1329_v42, %v1295_v31 }
  0xcb   : > { %v1338_v56 = vmul.f32 %v1330_v41, %v1296_v2  ;;  %v1339_v43 = vmul.f32 %v1331_v9, %v1297_v33  ;;  %v1340_v36 = vmul.f32 %v1332_v14, %v1298_v61  ;;  %v1341_v37 = vmul.f32 %v1333_v13, %v1299_v10 }
  0xcc   : > { %v1309_v7 = vadd.f32 %v2386_v34, %v1289_v47  ;;  %v1342_v38 = vmul.f32 0.16666667, %v1334_v53  ;;  %v1343_v39 = vmul.f32 0.16666667, %v1335_v52  ;;  %v1344_v8 = vmul.f32 0.16666667, %v1336_v54 }
  0xcd   : > { %v1345_v20 = vmul.f32 0.16666667, %v1337_v55  ;;  %v1346_v63 = vmul.f32 0.16666667, %v1338_v56  ;;  %v1347_v51 = vmul.f32 0.16666667, %v1339_v43 }
  0xce   : > { %v1348_v44 = vmul.f32 0.16666667, %v1340_v36  ;;  %v1349_v45 = vmul.f32 0.16666667, %v1341_v37  ;;  %v1350_v15 = vadd.f32 3.0, %v2397_v12  ;;  %v1351_v48 = vadd.f32 3.0, %v2400_v49 }
  0xcf   : > { %v1352_v35 = vadd.f32 3.0, %v2403_v17  ;;  %v1353_v50 = vadd.f32 3.0, %v2406_v19  ;;  %v1354_v16 = vadd.f32 3.0, %v2409_v0  ;;  %v1355_v34 = vadd.f32 3.0, %v2412_v18 }
  0xd0   : > { %v1356_v26 = vadd.f32 3.0, %v2415_v62  ;;  %v1357_v25 = vadd.f32 3.0, %v1309_v7  ;;  %v1358_v27 = vmax.f32 %v1350_v15, 0.0  ;;  %v1359_v46 = vmax.f32 %v1351_v48, 0.0 }
  0xd1   : > { %v1360_v31 = vmax.f32 %v1352_v35, 0.0  ;;  %v1361_v2 = vmax.f32 %v1353_v50, 0.0  ;;  %v1362_v33 = vmax.f32 %v1354_v16, 0.0  ;;  %v1363_v61 = vmax.f32 %v1355_v34, 0.0 }
  0xd2   : > { %v1364_v10 = vmax.f32 %v1356_v26, 0.0  ;;  %v1365_v47 = vmax.f32 %v1357_v25, 0.0  ;;  %v1366_v59 = vmin.f32 %v1358_v27, 6.0  ;;  %v1367_v40 = vmin.f32 %v1359_v46, 6.0 }
  0xd3   : > { %v1368_v6 = vmin.f32 %v1360_v31, 6.0  ;;  %v1369_v32 = vmin.f32 %v1361_v2, 6.0  ;;  %v1370_v21 = vmin.f32 %v1362_v33, 6.0  ;;  %v1371_v30 = vmin.f32 %v1363_v61, 6.0 }
  0xd4   : > { %v1372_v58 = vmin.f32 %v1364_v10, 6.0  ;;  %v1373_v23 = vmin.f32 %v1365_v47, 6.0  ;;  %v1374_v28 = vmul.f32 %v1366_v59, %v2397_v12  ;;  %v1375_v57 = vmul.f32 %v1367_v40, %v2400_v49 }
  0xd5   : > { %v1376_v60 = vmul.f32 %v1368_v6, %v2403_v17  ;;  %v1377_v11 = vmul.f32 %v1369_v32, %v2406_v19  ;;  %v1378_v24 = vmul.f32 %v1370_v21, %v2409_v0  ;;  %v1379_v29 = vmul.f32 %v1371_v30, %v2412_v18 }
  0xd6   : > { %v1380_v3 = vmul.f32 %v1372_v58, %v2415_v62  ;;  %v1381_v4 = vmul.f32 %v1373_v23, %v1309_v7  ;;  %v1382_v22 = vmul.f32 0.16666667, %v1374_v28  ;;  %v1383_v5 = vmul.f32 0.16666667, %v1375_v57 }
  0xd7   : > { %v1384_v1 = vmul.f32 0.16666667, %v1376_v60  ;;  %v1385_v42 = vmul.f32 0.16666667, %v1377_v11  ;;  %v1386_v41 = vmul.f32 0.16666667, %v1378_v24 }
  0xd8   : > { %v1387_v9 = vmul.f32 0.16666667, %v1379_v29  ;;  %v1388_v12 = vmul.f32 0.16666667, %v1380_v3  ;;  %v1389_v14 = vmul.f32 0.16666667, %v1381_v4  ;;  %v1390_v49 = vadd.f32 %v1382_v22, %v1342_v38 }
  0xd9   : > { %v1391_v13 = vadd.f32 %v1383_v5, %v1343_v39  ;;  %v1392_v17 = vadd.f32 %v1384_v1, %v1344_v8  ;;  %v1393_v53 = vadd.f32 %v1385_v42, %v1345_v20  ;;  %v1394_v19 = vadd.f32 %v1386_v41, %v1346_v63 }
  0xda   : > { %v1395_v52 = vadd.f32 %v1387_v9, %v1347_v51  ;;  %v1396_v0 = vadd.f32 %v1388_v12, %v1348_v44  ;;  %v1397_v54 = vadd.f32 %v1389_v14, %v1349_v45  ;;  %v1406_v18 = vrot.slane %v1390_v49, 3 }
  0xdb   : > { %v1407_v55 = vrot.slane %v1391_v13, 6  ;;  %v1408_v62 = vrot.slane %v1391_v13, 1  ;;  %v1409_v56 = vrot.slane %v1392_v17, 4  ;;  %v1410_v43 = vrot.slane %v1392_v17, 7 }
  0xdc   : > { %v1411_v36 = vrot.slane %v1393_v53, 2  ;;  %v1412_v37 = vrot.slane %v1393_v53, 5  ;;  %v1413_v7 = vrot.slane %v1394_v19, 3  ;;  %v1414_v15 = vrot.slane %v1395_v52, 6 }
  0xdd   : > { %v1415_v48 = vrot.slane %v1395_v52, 1  ;;  %v1416_v35 = vrot.slane %v1396_v0, 4  ;;  %v1417_v50 = vrot.slane %v1396_v0, 7  ;;  %v1418_v38 = vrot.slane %v1397_v54, 2 }
  0xde   : > { %v1419_v39 = vrot.slane %v1397_v54, 5  ;;  %v1420_v8 = vsel %vm674_vm0, %v1390_v49, %v1406_v18  ;;  %v1421_v20 = vsel %vm676_vm1, %v1407_v55, %v1408_v62  ;;  %v1423_v63 = vsel %vm680_vm3, %v1409_v56, %v1410_v43 }
  0xdf   : > { %v1422_v51 = vsel %vm678_vm2, %v1420_v8, %v1421_v20  ;;  %v1424_v44 = vsel %vm682_vm4, %v1411_v36, %v1412_v37  ;;  %v1427_v45 = vsel %vm674_vm0, %v1394_v19, %v1413_v7  ;;  %v1428_v16 = vsel %vm676_vm1, %v1414_v15, %v1415_v48 }
  0xe0   : > { %v1425_v34 = vsel %vm684_vm5, %v1423_v63, %v1424_v44  ;;  %v1429_v26 = vsel %vm678_vm2, %v1427_v45, %v1428_v16  ;;  %v1430_v25 = vsel %vm680_vm3, %v1416_v35, %v1417_v50  ;;  %v1431_v27 = vsel %vm682_vm4, %v1418_v38, %v1419_v39 }
  0xe1   : > { %v1426_v46 = vsel %vm686_vm6, %v1422_v51, %v1425_v34  ;;  %v1432_v31 = vsel %vm684_vm5, %v1430_v25, %v1431_v27 }
  0xe2   : > { %v1433_v2 = vsel %vm686_vm6, %v1429_v26, %v1432_v31  ;;  %1704 = vst [vmem:[%s2133_s13 + $0x2] ss:$4 sm:$0xff] %v1426_v46 }
  0xe3   : > { %1705 = vst [vmem:[%s2133_s13 + $0x22] ss:$4 sm:$0xff] %v1433_v2 }
  0xe4 PF: > { %s18_s20 = sadd.s32 1, %s1875_s20   ;;  %s2466_s18 = smov %s1871_s19 }
  0xe5   : > { %p15_p8 = scmp.ge.s32.totalorder %s18_s20, 4   ;;  %s2467_s19 = smov %s2469_s27 }
  0xe7   :  { %17 = sbr.rel (!%p15_p8) target bundleno = 4 (0x4), region = 92 }
  0xec   :  { %1470 = vsyncpa [#allocation3], 1 }
  0xed   :  { %1472 = vsyncpa [#allocation3 + $0x1], 1 }
  0xee   :  { %1473 = vsyncpa [#allocation5], 1 }
  0xef   :  { %1474 = vsyncpa [#allocation8], 1 }

</bundles_post_ra>
